<compile_context>
chip_gen: v7x
topology: tpu7x:2x2x1
jax: 0.10.0
libtpu: 0.0.40
codegen_flags: <defaults>
</compile_context>

<pallas_src>
import functools
import math

import jax
import jax.numpy as jnp
from jax.experimental import pallas as pl
from jax.experimental.pallas import tpu as pltpu


def _vmem_cap_bytes():
    """~80% of physical VMEM (v5e/v6e: 128 MiB, v7x: 64 MiB), safe fallback."""
    try:
        info = pltpu.get_tpu_info()
        phys = int(getattr(info, "vmem_capacity_bytes", 0))
        if phys > 0:
            return int(phys * 4 // 5)
    except Exception:
        pass
    return 48 * 1024 * 1024  # fits every generation (v7x physical = 64 MiB)


def _masked_conv2d_kernel(x_ref, w_ref, o_ref, *, kh, kw, toh, ow):
    """One (batch image, output-row tile) grid step.

    x_ref: (1, TH, W, C)       halo window for this row tile (TH = toh+kh-1)
    w_ref: (KT_pad, OC_pad)    im2col-packed, mask-folded, bf16 weights (resident)
    o_ref: (1, toh*ow, OC_pad) flattened, lane-dense output tile (f32)
    """
    c = x_ref.shape[3]
    kt = kh * kw * c
    kt_pad = w_ref.shape[0]

    xw = x_ref[0]                                            # (TH, W, C) f32

    # im2col: gather all KH*KW taps once, zero-pad K to the lane-dense KT_pad,
    # then a single MXU matmul (toh*ow, KT_pad) @ (KT_pad, OC_pad).
    taps = []
    for i in range(kh):
        for j in range(kw):
            taps.append(xw[i:i + toh, j:j + ow, :])          # (toh, ow, C)
    if kt_pad > kt:
        taps.append(jnp.zeros((toh, ow, kt_pad - kt), xw.dtype))
    patch = jnp.concatenate(taps, axis=-1).reshape(toh * ow, kt_pad)

    # bf16 MXU operands, f32 accumulation.
    out = jnp.dot(patch.astype(w_ref.dtype), w_ref[...],
                  preferred_element_type=jnp.float32)

    o_ref[...] = out[None].astype(o_ref.dtype)


def execute_2d_convolution(data_in_nchw, weight_oihw, mask_oihw, *, row_tile=None):
    """Masked conv2d: out = conv2d(x, weight * mask), stride=1, pad=0, groups=1.

    Args:
      data_in_nchw: (N, C, H, W) float32
      weight_oihw:  (OC, C, KH, KW) float32
      mask_oihw:    (OC, C, KH, KW) float32
      row_tile:     optional output-row tile size (None -> heuristic)
    Returns:
      (N, OC, OH, OW) float32, OH = H-KH+1, OW = W-KW+1
    """
    N, C, H, W = data_in_nchw.shape
    OC, _, KH, KW = weight_oihw.shape
    OH, OW = H - KH + 1, W - KW + 1
    assert OH > 0 and OW > 0

    # --- MulExpander folded into the wrapper (runs once, not per grid step) --
    w_eff = weight_oihw * mask_oihw

    KT = KH * KW * C
    KT_pad = ((KT + 127) // 128) * 128                       # lane-dense K
    OC_pad = ((OC + 127) // 128) * 128                       # lane-dense OC

    # (kh,kw,c)-major contraction rows, zero-padded, bf16 MXU operand.
    w_packed = jnp.transpose(w_eff, (2, 3, 1, 0)).reshape(KT, OC)
    w_packed = jnp.pad(w_packed, ((0, KT_pad - KT), (0, OC_pad - OC)))
    w_packed = w_packed.astype(jnp.bfloat16)

    # --- per-generation VMEM plan -------------------------------------------
    cap = _vmem_cap_bytes()

    def _est_bytes(rt):
        th = rt + KH - 1
        m = rt * OW
        return (2 * th * W * C * 4              # double-buffered f32 halo window
                + th * W * C * 4                # loaded window value in-kernel
                + 2 * KT_pad * OC_pad * 2       # bf16 packed weights (2 bufs)
                + 2 * m * OC_pad * 4            # double-buffered f32 out tile
                + 2 * m * KT_pad * 4            # f32 taps + concatenated patch
                + m * KT_pad * 2                # bf16 patch (MXU operand)
                + m * OC_pad * 4)               # f32 matmul result

    # M = row_tile*OW kept a multiple of 8 (dense output stores); target
    # ~1-2K flattened output rows per step, shrunk to fit the VMEM budget.
    step = 8 // math.gcd(OW, 8)
    if row_tile is None:
        rt = max(step, -(-2048 // OW))                       # M ~ 2048
        rt = min(rt, -(-OH // step) * step)                  # no more than covers OH
        rt = -(-rt // step) * step
        budget = cap // 2
        while rt > step and _est_bytes(rt) > budget:
            rt -= step
        row_tile = rt
    row_tile = max(1, int(row_tile))

    n_row_tiles = -(-OH // row_tile)
    OH_pad = n_row_tiles * row_tile
    TH = row_tile + KH - 1                                   # halo window height
    H_pad = OH_pad + KH - 1
    M = row_tile * OW

    # --- wrapper-side layout plumbing ---------------------------------------
    # NCHW -> NHWC, zero-pad rows so every window is in-bounds, then unfold
    # into per-row-tile halo windows (each grid step DMAs only its window).
    x_nhwc = jnp.transpose(data_in_nchw, (0, 2, 3, 1))
    if H_pad > H:
        x_nhwc = jnp.pad(x_nhwc, ((0, 0), (0, H_pad - H), (0, 0), (0, 0)))
    row_idx = (jnp.arange(n_row_tiles) * row_tile)[:, None] + jnp.arange(TH)[None, :]
    x_win = x_nhwc[:, row_idx]                               # (N, nt, TH, W, C)
    x_win = x_win.reshape(N * n_row_tiles, TH, W, C)

    grid = (N, n_row_tiles)
    kernel = functools.partial(_masked_conv2d_kernel, kh=KH, kw=KW,
                               toh=row_tile, ow=OW)

    work = _est_bytes(row_tile)
    vmem_limit = int(min(cap, max(work + work // 2, 16 * 1024 * 1024)))

    cost = pl.CostEstimate(
        flops=2 * N * OH * OW * KT * OC,
        transcendentals=0,
        bytes_accessed=(4 * N * H * W * C + 2 * KT_pad * OC_pad
                        + 4 * N * OH * OW * OC))

    out_pad = pl.pallas_call(
        kernel,
        out_shape=jax.ShapeDtypeStruct((N, OH_pad * OW, OC_pad), jnp.float32),
        grid=grid,
        in_specs=[
            # Per-(image, row-tile) halo window; last two dims are full extents.
            pl.BlockSpec((1, TH, W, C),
                         lambda n, r: (n * n_row_tiles + r, 0, 0, 0)),
            # Packed, masked, bf16 weights: constant index -> VMEM-resident.
            pl.BlockSpec((KT_pad, OC_pad), lambda n, r: (0, 0)),
        ],
        out_specs=pl.BlockSpec((1, M, OC_pad), lambda n, r: (n, r, 0)),
        compiler_params=pltpu.CompilerParams(
            dimension_semantics=("parallel", "parallel"),
            vmem_limit_bytes=vmem_limit),
        cost_estimate=cost,
    )(x_win, w_packed)

    out = out_pad.reshape(N, OH_pad, OW, OC_pad)[:, :OH, :, :OC]
    return jnp.transpose(out, (0, 3, 1, 2))                  # NHWC -> NCHW


if __name__ == "__main__":
    key = jax.random.PRNGKey(0)
    k_x, k_w, k_m = jax.random.split(key, 3)

    # Small shapes consistent with the module's forward:
    #   dataIn:   (N=2, C=4, H=16, W=16)
    #   weightIn: (OC=8, C=4, KH=3, KW=3)
    #   mask:     same shape as weightIn (the "expander" sparsity mask)
    N, C, H, W = 2, 4, 16, 16
    OC, KH, KW = 8, 3, 3

    x = jax.random.normal(k_x, (N, C, H, W), dtype=jnp.float32)
    weight = jax.random.normal(k_w, (OC, C, KH, KW), dtype=jnp.float32) * 0.1
    mask = jax.random.bernoulli(k_m, p=0.5, shape=(OC, C, KH, KW)).astype(jnp.float32)

    # Reference: XLA conv with masked weights (the module's exact semantics).
    ref = jax.lax.conv_general_dilated(
        x, weight * mask, window_strides=(1, 1), padding="VALID",
        dimension_numbers=("NCHW", "OIHW", "NCHW"))

    # Heuristic tiling (single row tile per image) ...
    out1 = jax.block_until_ready(execute_2d_convolution(x, weight, mask))
    # ... and an explicit row_tile=8 to exercise the multi-tile halo path
    # (grid = (2, 2), output-row padding stripped in the wrapper).
    out2 = jax.block_until_ready(execute_2d_convolution(x, weight, mask, row_tile=8))

    assert out1.shape == (N, OC, H - KH + 1, W - KW + 1)
    assert out2.shape == (N, OC, H - KH + 1, W - KW + 1)
    # bf16 MXU operands with f32 accumulation -> small, bounded deviation.
    assert jnp.allclose(out1, ref, atol=3e-2, rtol=3e-2)
    assert jnp.allclose(out2, ref, atol=3e-2, rtol=3e-2)

    print("KERNEL_OK")
</pallas_src>

<mosaic_0001>
module attributes {stable_mosaic.version = 11 : i64} {
  func.func @_masked_conv2d_kernel(%arg0: i32, %arg1: i32, %arg2: memref<1x18x16x4xf32, #tpu.memory_space<vmem>>, %arg3: memref<128x128xbf16, #tpu.memory_space<vmem>>, %arg4: memref<1x224x128xf32, #tpu.memory_space<vmem>>) attributes {dimension_semantics = [#tpu.dimension_semantics<parallel>, #tpu.dimension_semantics<parallel>], iteration_bounds = array<i64: 2, 1>, scalar_prefetch = 0 : i64, scratch_operands = 0 : i64, tpu.core_type = #tpu.core_type<tc>, window_params = [{transform_indices = @transform_0, window_bounds = array<i64: 1, 18, 16, 4>}, {pipeline_mode = #tpu.pipeline_mode<synchronous>, transform_indices = @transform_1, window_bounds = array<i64: 128, 128>}, {transform_indices = @transform_2, window_bounds = array<i64: 1, 224, 128>}]} {
    %c0 = arith.constant 0 : index
    %c0_0 = arith.constant 0 : index
    %c0_1 = arith.constant 0 : index
    %c0_2 = arith.constant 0 : index
    %0 = vector.load %arg2[%c0, %c0_0, %c0_1, %c0_2] : memref<1x18x16x4xf32, #tpu.memory_space<vmem>>, vector<1x18x16x4xf32>
    %1 = vector.shape_cast %0 : vector<1x18x16x4xf32> to vector<18x16x4xf32>
    %2 = vector.extract_strided_slice %1 {offsets = [0, 0, 0], sizes = [16, 14, 4], strides = [1, 1, 1]} : vector<18x16x4xf32> to vector<16x14x4xf32>
    %3 = vector.extract_strided_slice %1 {offsets = [0, 1, 0], sizes = [16, 14, 4], strides = [1, 1, 1]} : vector<18x16x4xf32> to vector<16x14x4xf32>
    %4 = vector.extract_strided_slice %1 {offsets = [0, 2, 0], sizes = [16, 14, 4], strides = [1, 1, 1]} : vector<18x16x4xf32> to vector<16x14x4xf32>
    %5 = vector.extract_strided_slice %1 {offsets = [1, 0, 0], sizes = [16, 14, 4], strides = [1, 1, 1]} : vector<18x16x4xf32> to vector<16x14x4xf32>
    %6 = vector.extract_strided_slice %1 {offsets = [1, 1, 0], sizes = [16, 14, 4], strides = [1, 1, 1]} : vector<18x16x4xf32> to vector<16x14x4xf32>
    %7 = vector.extract_strided_slice %1 {offsets = [1, 2, 0], sizes = [16, 14, 4], strides = [1, 1, 1]} : vector<18x16x4xf32> to vector<16x14x4xf32>
    %8 = vector.extract_strided_slice %1 {offsets = [2, 0, 0], sizes = [16, 14, 4], strides = [1, 1, 1]} : vector<18x16x4xf32> to vector<16x14x4xf32>
    %9 = vector.extract_strided_slice %1 {offsets = [2, 1, 0], sizes = [16, 14, 4], strides = [1, 1, 1]} : vector<18x16x4xf32> to vector<16x14x4xf32>
    %10 = vector.extract_strided_slice %1 {offsets = [2, 2, 0], sizes = [16, 14, 4], strides = [1, 1, 1]} : vector<18x16x4xf32> to vector<16x14x4xf32>
    %cst = arith.constant 0.000000e+00 : f32
    %11 = vector.broadcast %cst : f32 to vector<16x14x92xf32>
    %12 = tpu.concatenate %2, %3, %4, %5, %6, %7, %8, %9, %10, %11 in 2 : vector<16x14x4xf32>, vector<16x14x4xf32>, vector<16x14x4xf32>, vector<16x14x4xf32>, vector<16x14x4xf32>, vector<16x14x4xf32>, vector<16x14x4xf32>, vector<16x14x4xf32>, vector<16x14x4xf32>, vector<16x14x92xf32> -> vector<16x14x128xf32>
    %13 = vector.shape_cast %12 : vector<16x14x128xf32> to vector<224x128xf32>
    %14 = arith.truncf %13 : vector<224x128xf32> to vector<224x128xbf16>
    %c0_3 = arith.constant 0 : index
    %c0_4 = arith.constant 0 : index
    %15 = vector.load %arg3[%c0_3, %c0_4] : memref<128x128xbf16, #tpu.memory_space<vmem>>, vector<128x128xbf16>
    %cst_5 = arith.constant dense<0.000000e+00> : vector<224x128xf32>
    %16 = tpu.matmul %14, %15, %cst_5 {dimension_numbers = #tpu.dot_dimension_numbers<[1], [0], [0], [1], [0, 0, 1, 1], [], []>} : vector<224x128xbf16>, vector<128x128xbf16>, vector<224x128xf32> -> vector<224x128xf32>
    %17 = vector.shape_cast %16 : vector<224x128xf32> to vector<1x224x128xf32>
    %c0_6 = arith.constant 0 : index
    %c0_7 = arith.constant 0 : index
    %c0_8 = arith.constant 0 : index
    %18 = vector.load %arg4[%c0_6, %c0_7, %c0_8] : memref<1x224x128xf32, #tpu.memory_space<vmem>>, vector<1x224x128xf32>
    tpu.vector_store %arg4[%c0_6, %c0_7, %c0_8], %17 {strides = array<i32>} : memref<1x224x128xf32, #tpu.memory_space<vmem>>, vector<1x224x128xf32>,
    return
  }
  func.func @transform_0(%arg0: i32, %arg1: i32) -> (i32, i32, i32, i32) {
    %c1_i32 = arith.constant 1 : i32
    %0 = arith.muli %arg0, %c1_i32 : i32
    %1 = arith.addi %0, %arg1 : i32
    %c0_i32 = arith.constant 0 : i32
    %c0_i32_0 = arith.constant 0 : i32
    %c0_i32_1 = arith.constant 0 : i32
    %c0_i32_2 = arith.constant 0 : i32
    return %1, %c0_i32, %c0_i32_0, %c0_i32_1 : i32, i32, i32, i32
  }
  func.func @transform_1(%arg0: i32, %arg1: i32) -> (i32, i32) {
    %c0_i32 = arith.constant 0 : i32
    %c0_i32_0 = arith.constant 0 : i32
    %c0_i32_1 = arith.constant 0 : i32
    return %c0_i32, %c0_i32_0 : i32, i32
  }
  func.func @transform_2(%arg0: i32, %arg1: i32) -> (i32, i32, i32) {
    %c0_i32 = arith.constant 0 : i32
    %c0_i32_0 = arith.constant 0 : i32
    return %arg0, %arg1, %c0_i32 : i32, i32, i32
  }
}

</mosaic_0001>

<bundles_post_ra>
// kernel: tpu_custom_call.1
= control target key start
LH: loop header
LB: loop body
LE: loop exit
PB: predicated region body
PF: predicated region fallthrough
CT: control target
= control target key end

     0   :  { %7 = vsyncpa [#allocation3], 0  ;;  %s5195_s0 = inlined_call_operand.vmem [shape: f32[2,18,16,4], index: 0, kind: input, shape index: {}]   ;;  %s5196_s1 = inlined_call_operand.vmem [shape: bf16[128,128], index: 1, kind: input, shape index: {}]   ;;  %s5197_s2 = inlined_call_operand.hbm [shape: f32[2,224,128], index: 2, kind: output, shape index: {}]  }
   0x1   :  { %9 = vsyncpa [#allocation3 + $0x1], 0  ;;  %s3118_s9 = smov 0   ;;  %s3120_s10 = smov 0  }
   0x2   :  { %s3122_s11 = smov 0   ;;  %s3124_s12 = smov 0  }
   0x3   :  { %s3126_s13 = smov 0   ;;  %s3128_s14 = smov 0  }
   0x4 LB: > { %s2816_s15 = sadd.s32 4294967295, %s3090_s14   ;;  %s2817_s16 = sadd.s32 4294967294, %s3090_s14   ;;  %s3090_s14 = sphi %s3128_s14, %s15_s14   ;;  %s3086_s13 = sphi %s3126_s13, %s5478_s13   ;;  %s3082_s12 = sphi %s3124_s12, %s5477_s12   ;;  %s3078_s11 = sphi %s3122_s11, %s5476_s11   ;;  %s3074_s10 = sphi %s3120_s10, %s5475_s10   ;;  %s3070_s9 = sphi %s3118_s9, %s5474_s9  }
   0x5   : > { %s27_s17 = sadd.s32 1, %s3086_s13  ;;  %s85_s18 = sadd.s32 1, %s3078_s11 }
   0x6   : > { %p29_p0 = scmp.ge.s32.totalorder %s27_s17, 2  ;;  %p95_p1 = scmp.ne.s32.totalorder %s3078_s11, %s3074_s10 }
   0x7   : > { %p96_p2 = scmp.eq.s32.totalorder %s2816_s15, 1  ;;  %p101_p3 = scmp.ne.s32.totalorder %s3074_s10, %s3070_s9 }
   0x8   : > { %s5480_s17 = smov (%p29_p0, %s27_s17), 0  ;;  %p102_p5 = scmp.eq.s32.totalorder %s2817_s16, 1 }
   0x9   : > { %p3158_p4 = por %p96_p2, %p95_p1  ;;  %s80_s20 = ssub.s32 %s3086_s13, %s5480_s17 }
   0xa   : > { %p2820_p6 = scmp.ge.s32.totalorder %s3090_s14, 1  ;;  %p83_p7 = scmp.eq.s32.totalorder %s80_s20, 0 }
   0xb   : > { %p3165_p8 = por %p102_p5, %p101_p3  ;;  %p133_p9 = scmp.lt.s32.totalorder %s3090_s14, 3 }
   0xc   : > { %s3171_s22 = scalar_select %p83_p7, %s3078_s11, %s85_s18  }
   0xd   : > { %p134_p10 = pnand %p2820_p6, %p133_p9 }
   0xf   : > { %137 = sbr.rel (%p134_p10) target bundleno = 903 (0x387), region = 28 }
  0x16   : > { %p157_p11 = scmp.lt.s32.totalorder %s3082_s12, 1  ;;  %vm233_vm0 = vcmask 1046528   ;;  %s3092_s28 = smov 4   ;;  %vm378_vm1 = vcmask 1045504   ;;  %vm1115_vm2 = vcmask 31744   ;;  %vm1148_vm3 = vcmask 64512  }
  0x17   : > { %s3093_s29 = smov 8   ;;  %s3094_s30 = smov 12   ;;  %vm1181_vm4 = vcmask 97280   ;;  %vm1214_vm5 = vcmask 130048   ;;  %vm1247_vm6 = vcmask 162816   ;;  %vm1280_vm7 = vcmask 195584  }
  0x18   : > { %s158_s23 = scalar_select %p157_p11, %s3082_s12, 1  ;;  %vm1313_vm8 = vcmask 228352   ;;  %vm1346_vm9 = vcmask 261120   ;;  %vm1379_vm10 = vcmask 293888  }
  0x19   : > { %s3095_s3 = smov 16   ;;  %s3096_s4 = smov 20  }
  0x1a   : > { %s2916_s24 = smul.u32 288, %s158_s23  ;;  %s3097_s5 = smov 24  }
  0x1b   : > { %s3098_s16 = smov 28   ;;  %s3099_s25 = smov 32  }
  0x1c   : > { %s3178_s27 = scalar_lea.vmem %s5195_s0, %s2916_s24  ;;  %s3101_s26 = smov [#allocation2]  }
  0x1d   : > { %v3181_v0 = vld [vmem:[%s3178_s27 + $0x18] sm:$0xff]  ;;  %v3184_v1 = vld [vmem:[%s3178_s27 + $0x8] sm:$0xff]  ;;  %v3194_v5 = vld [vmem:[%s3178_s27] sm:$0xff] }
  0x1e   : > { %v3187_v2 = vld [vmem:[%s3178_s27 + $0x28] sm:$0xff]  ;;  %v3190_v3 = vrot.slane %v3181_v0, 1  ;;  %v235_v4 = vrot.slane %v3184_v1, 1  ;;  %v3197_v6 = vld [vmem:[%s3178_s27 + $0x10] sm:$0xff]  ;;  %v3200_v7 = vld [vmem:[%s3178_s27 + $0x20] sm:$0xff]  ;;  %v234_v8 = vrot.slane %v3194_v5, 1 }
  0x1f   : > { %v3207_v9 = vrot.slane %v3187_v2, 1  ;;  %v237_v11 = vrot.slane %v3197_v6, 1  ;;  %v240_v12 = vrot.slane %v3200_v7, 1  ;;  %v3213_v13 = vld [vmem:[%s3178_s27 + $0x38] sm:$0xff]  ;;  %v3216_v14 = vld [vmem:[%s3178_s27 + $0x30] sm:$0xff]  ;;  %v3234_v19 = vld [vmem:[%s3178_s27 + $0x48] sm:$0xff] }
  0x20   : > { %288 = vrot.lane.b32.xlu1 %v3190_v3, %s3092_s28  ;;  %284 = vrot.lane.b32.xlu0 %v235_v4, %s3092_s28  ;;  %v236_v10 = vsel %vm233_vm0, %v234_v8, %v235_v4  ;;  %v3230_v17 = vrot.slane %v3213_v13, 1  ;;  %v243_v18 = vrot.slane %v3216_v14, 1  ;;  %v3237_v20 = vld [vmem:[%s3178_s27 + $0x40] sm:$0xff]  ;;  %v3248_v22 = vrot.slane %v3234_v19, 1  ;;  %v3252_v24 = vld [vmem:[%s3178_s27 + $0x58] sm:$0xff] }
  0x21   : > { %v3223_v15 = vsel %vm233_vm0, %v237_v11, %v3190_v3  ;;  %v3227_v16 = vsel %vm233_vm0, %v240_v12, %v3207_v9  ;;  %v246_v23 = vrot.slane %v3237_v20, 1  ;;  %v3255_v25 = vld [vmem:[%s3178_s27 + $0x50] sm:$0xff]  ;;  %v3266_v27 = vrot.slane %v3252_v24, 1  ;;  %v3270_v29 = vld [vmem:[%s3178_s27 + $0x68] sm:$0xff]  ;;  %v3273_v30 = vld [vmem:[%s3178_s27 + $0x60] sm:$0xff] }
  0x22   : > { %5304 = vst [vmem:[#allocation5_spill] sm:$0xff] %v3230_v17  ;;  %v3245_v21 = vsel %vm233_vm0, %v243_v18, %v3230_v17  ;;  %5305 = vst [vmem:[#allocation6_spill] sm:$0xff] %v3248_v22  ;;  %v249_v28 = vrot.slane %v3255_v25, 1  ;;  %v3284_v32 = vrot.slane %v3270_v29, 1  ;;  %v252_v33 = vrot.slane %v3273_v30, 1  ;;  %v3288_v34 = vld [vmem:[%s3178_s27 + $0x78] sm:$0xff] }
  0x23   : > { %v3263_v26 = vsel %vm233_vm0, %v246_v23, %v3248_v22  ;;  %5307 = vst [vmem:[#allocation8_spill] sm:$0xff] %v3266_v27  ;;  %v3291_v35 = vld [vmem:[%s3178_s27 + $0x70] sm:$0xff]  ;;  %v3302_v37 = vrot.slane %v3288_v34, 1  ;;  %v3306_v39 = vld [vmem:[%s3178_s27 + $0x88] sm:$0xff]  ;;  %v3309_v40 = vld [vmem:[%s3178_s27 + $0x80] sm:$0xff] }
  0x24   : > { %292 = vrot.lane.b32.xlu1 %v3207_v9, %s3092_s28  ;;  %282 = vrot.lane.b32.xlu0 %v236_v10, %s3092_s28  ;;  %5306 = vst [vmem:[#allocation7_spill] sm:$0xff] %v3263_v26  ;;  %v3281_v31 = vsel %vm233_vm0, %v249_v28, %v3266_v27  ;;  %5309 = vst [vmem:[#allocation10_spill] sm:$0xff] %v3284_v32  ;;  %v3299_v36 = vsel %vm233_vm0, %v252_v33, %v3284_v32  ;;  %v255_v38 = vrot.slane %v3291_v35, 1  ;;  %v3324_v44 = vld [vmem:[%s3178_s27 + $0x98] sm:$0xff]  ;;  %v3327_v45 = vld [vmem:[%s3178_s27 + $0x90] sm:$0xff] }
  0x25   : > { %5308 = vst [vmem:[#allocation9_spill] sm:$0xff] %v3281_v31  ;;  %5310 = vst [vmem:[#allocation11_spill] sm:$0xff] %v3299_v36  ;;  %v3320_v42 = vrot.slane %v3306_v39, 1  ;;  %v258_v43 = vrot.slane %v3309_v40, 1  ;;  %v3338_v47 = vrot.slane %v3324_v44, 1  ;;  %v261_v48 = vrot.slane %v3327_v45, 1 }
  0x26   : > { %5311 = vst [vmem:[#allocation12_spill] sm:$0xff] %v3302_v37  ;;  %v3317_v41 = vsel %vm233_vm0, %v255_v38, %v3302_v37  ;;  %v3342_v49 = vld [vmem:[%s3178_s27 + $0xa8] sm:$0xff]  ;;  %v3345_v50 = vld [vmem:[%s3178_s27 + $0xa0] sm:$0xff]  ;;  %v3360_v54 = vld [vmem:[%s3178_s27 + $0xb8] sm:$0xff] }
  0x27   : > { %5312 = vst [vmem:[#allocation13_spill] sm:$0xff] %v3317_v41  ;;  %5313 = vst [vmem:[#allocation14_spill] sm:$0xff] %v3320_v42  ;;  %v3335_v46 = vsel %vm233_vm0, %v258_v43, %v3320_v42  ;;  %v3353_v51 = vsel %vm233_vm0, %v261_v48, %v3338_v47  ;;  %v3356_v52 = vrot.slane %v3342_v49, 1  ;;  %v264_v53 = vrot.slane %v3345_v50, 1  ;;  %v3363_v55 = vld [vmem:[%s3178_s27 + $0xb0] sm:$0xff]  ;;  %v3378_v59 = vld [vmem:[%s3178_s27 + $0xc8] sm:$0xff] }
  0x28   : > { %286 = vrot.lane.b32.xlu1 %v3223_v15, %s3092_s28  ;;  %290 = vrot.lane.b32.xlu0 %v3227_v16, %s3092_s28  ;;  %5314 = vst [vmem:[#allocation15_spill] sm:$0xff] %v3335_v46  ;;  %5315 = vst [vmem:[#allocation16_spill] sm:$0xff] %v3338_v47  ;;  %v3374_v57 = vrot.slane %v3360_v54, 1  ;;  %v267_v58 = vrot.slane %v3363_v55, 1  ;;  %v3381_v60 = vld [vmem:[%s3178_s27 + $0xc0] sm:$0xff]  ;;  %v3392_v62 = vrot.slane %v3378_v59, 1 }
  0x29   : > { %5316 = vst [vmem:[#allocation17_spill] sm:$0xff] %v3353_v51  ;;  %5317 = vst [vmem:[#allocation18_spill] sm:$0xff] %v3356_v52  ;;  %v3371_v56 = vsel %vm233_vm0, %v264_v53, %v3356_v52  ;;  %v270_v63 = vrot.slane %v3381_v60, 1  ;;  %v3396_v4 = vld [vmem:[%s3178_s27 + $0xd8] sm:$0xff]  ;;  %v3399_v8 = vld [vmem:[%s3178_s27 + $0xd0] sm:$0xff] }
  0x2a   : > { %5318 = vst [vmem:[#allocation19_spill] sm:$0xff] %v3371_v56  ;;  %5319 = vst [vmem:[#allocation20_spill] sm:$0xff] %v3374_v57  ;;  %v3389_v61 = vsel %vm233_vm0, %v267_v58, %v3374_v57  ;;  %v3410_v11 = vrot.slane %v3396_v4, 1  ;;  %v273_v12 = vrot.slane %v3399_v8, 1  ;;  %v3414_v18 = vld [vmem:[%s3178_s27 + $0xe8] sm:$0xff]  ;;  %v3417_v23 = vld [vmem:[%s3178_s27 + $0xe0] sm:$0xff] }
  0x2b   : > { %5320 = vst [vmem:[#allocation21_spill] sm:$0xff] %v3389_v61  ;;  %5321 = vst [vmem:[#allocation22_spill] sm:$0xff] %v3392_v62  ;;  %v3407_v10 = vsel %vm233_vm0, %v270_v63, %v3392_v62  ;;  %v3428_v33 = vrot.slane %v3414_v18, 1  ;;  %v276_v38 = vrot.slane %v3417_v23, 1  ;;  %v3432_v43 = vld [vmem:[%s3178_s27 + $0xf8] sm:$0xff]  ;;  %v3435_v48 = vld [vmem:[%s3178_s27 + $0xf0] sm:$0xff] }
  0x2c   : > { %296 = vrot.lane.b32.xlu1 %v3230_v17, %s3092_s28  ;;  %294 = vrot.lane.b32.xlu0 %v3245_v21, %s3092_s28  ;;  %5322 = vst [vmem:[#allocation23_spill] sm:$0xff] %v3407_v10  ;;  %5323 = vst [vmem:[#allocation24_spill] sm:$0xff] %v3410_v11  ;;  %v3425_v28 = vsel %vm233_vm0, %v273_v12, %v3410_v11  ;;  %v3446_v58 = vrot.slane %v3432_v43, 1  ;;  %v279_v63 = vrot.slane %v3435_v48, 1 }
  0x2d   : > { %5324 = vst [vmem:[#allocation25_spill] sm:$0xff] %v3414_v18  ;;  %5325 = vst [vmem:[#allocation26_spill] sm:$0xff] %v3417_v23  ;;  %v3443_v53 = vsel %vm233_vm0, %v276_v38, %v3428_v33  ;;  %v379_v38 = vrot.slane %v3194_v5, 2  ;;  %v3475_v5 = vrot.slane %v3187_v2, 2 }
  0x2e   : > { %5326 = vst [vmem:[#allocation27_spill] sm:$0xff] %v3425_v28  ;;  %5327 = vst [vmem:[#allocation28_spill] sm:$0xff] %v3428_v33  ;;  %v3455_v12 = vsel %vm233_vm0, %v279_v63, %v3446_v58  ;;  %v385_v63 = vrot.slane %v3200_v7, 2 }
  0x2f   : > { %5328 = vst [vmem:[#allocation29_spill] sm:$0xff] %v3432_v43  ;;  %5329 = vst [vmem:[#allocation30_spill] sm:$0xff] %v3435_v48 }
  0x30   : > { %300 = vrot.lane.b32.xlu1 %v3248_v22, %s3092_s28  ;;  %298 = vrot.lane.b32.xlu0 %v3263_v26, %s3092_s28  ;;  %5330 = vst [vmem:[#allocation31_spill] sm:$0xff] %v3443_v53  ;;  %5331 = vst [vmem:[#allocation32_spill] sm:$0xff] %v3446_v58 }
  0x31   : > { %5332 = vst [vmem:[#allocation33_spill] sm:$0xff] %v3455_v12 }
  0x34   : > { %304 = vrot.lane.b32.xlu1 %v3266_v27, %s3092_s28  ;;  %302 = vrot.lane.b32.xlu0 %v3281_v31, %s3092_s28 }
  0x38   : > { %308 = vrot.lane.b32.xlu1 %v3284_v32, %s3092_s28  ;;  %306 = vrot.lane.b32.xlu0 %v3299_v36, %s3092_s28  ;;  %v3523_v32 = vrot.slane %v3270_v29, 2  ;;  %v3619_v36 = vrot.slane %v3414_v18, 2 }
  0x3a   : > { %5338 = vst [vmem:[#allocation39_spill] sm:$0xff] %v3523_v32  ;;  %5354 = vst [vmem:[#allocation55_spill] sm:$0xff] %v3619_v36 }
  0x3c   : > { %312 = vrot.lane.b32.xlu1 %v3302_v37, %s3092_s28  ;;  %310 = vrot.lane.b32.xlu0 %v3317_v41, %s3092_s28  ;;  %v3535_v41 = vrot.slane %v3288_v34, 2 }
  0x3e   : > { %5340 = vst [vmem:[#allocation41_spill] sm:$0xff] %v3535_v41 }
  0x40   : > { %316 = vrot.lane.b32.xlu1 %v3320_v42, %s3092_s28  ;;  %314 = vrot.lane.b32.xlu0 %v3335_v46, %s3092_s28  ;;  %v3465_v42 = vrot.slane %v3181_v0, 2 }
  0x44   : > { %320 = vrot.lane.b32.xlu1 %v3338_v47, %s3092_s28  ;;  %318 = vrot.lane.b32.xlu0 %v3353_v51, %s3092_s28  ;;  %v380_v47 = vrot.slane %v3184_v1, 2 }
  0x46   : > { %v381_v51 = vsel %vm378_vm1, %v379_v38, %v380_v47 }
  0x48   : > { %324 = vrot.lane.b32.xlu1 %v3356_v52, %s3092_s28  ;;  %322 = vrot.lane.b32.xlu0 %v3371_v56, %s3092_s28 }
  0x4c   : > { %328 = vrot.lane.b32.xlu1 %v3374_v57, %s3092_s28  ;;  %326 = vrot.lane.b32.xlu0 %v3389_v61, %s3092_s28 }
  0x50   : > { %332 = vrot.lane.b32.xlu1 %v3392_v62, %s3092_s28  ;;  %330 = vrot.lane.b32.xlu0 %v3407_v10, %s3092_s28  ;;  %v3607_v62 = vrot.slane %v3396_v4, 2 }
  0x52   : > { %5352 = vst [vmem:[#allocation53_spill] sm:$0xff] %v3607_v62 }
  0x54   : > { %336 = vrot.lane.b32.xlu1 %v3410_v11, %s3092_s28  ;;  %334 = vrot.lane.b32.xlu0 %v3425_v28, %s3092_s28  ;;  %v3559_v28 = vrot.slane %v3324_v44, 2 }
  0x56   : > { %5344 = vst [vmem:[#allocation45_spill] sm:$0xff] %v3559_v28 }
  0x58   : > { %340 = vrot.lane.b32.xlu1 %v3428_v33, %s3092_s28  ;;  %338 = vrot.lane.b32.xlu0 %v3443_v53, %s3092_s28  ;;  %v382_v33 = vrot.slane %v3197_v6, 2 }
  0x5a   : > { %v3472_v1 = vsel %vm378_vm1, %v382_v33, %v3465_v42  ;;  %v388_v33 = vrot.slane %v3216_v14, 2 }
  0x5c   : > { %344 = vrot.lane.b32.xlu1 %v3446_v58, %s3092_s28  ;;  %342 = vrot.lane.b32.xlu0 %v3455_v12, %s3092_s28  ;;  %v3499_v58 = vrot.slane %v3234_v19, 2  ;;  %v3511_v12 = vrot.slane %v3252_v24, 2  ;;  %s3016_s28 = sshll.u32 %s3101_s26, 4  ;;  %s3017_s28 = int_to_ptr.vmem [resolvable:$false] %s3016_s28 }
  0x5e   : > { %5334 = vst [vmem:[#allocation35_spill] sm:$0xff] %v3499_v58  ;;  %5336 = vst [vmem:[#allocation37_spill] sm:$0xff] %v3511_v12 }
  0x60   : > { %429 = vrot.lane.b32.xlu1 %v380_v47, %s3093_s29  ;;  %427 = vrot.lane.b32.xlu0 %v381_v51, %s3093_s29  ;;  %v3484_v47 = vsel %vm378_vm1, %v385_v63, %v3475_v5  ;;  %v3487_v51 = vrot.slane %v3213_v13, 2  ;;  %v391_v63 = vrot.slane %v3237_v20, 2 }
  0x62   : > { %5333 = vst [vmem:[#allocation34_spill] sm:$0xff] %v3487_v51  ;;  %v3496_v38 = vsel %vm378_vm1, %v388_v33, %v3487_v51  ;;  %v3508_v46 = vsel %vm378_vm1, %v391_v63, %v3499_v58  ;;  %v394_v33 = vrot.slane %v3255_v25, 2  ;;  %v397_v63 = vrot.slane %v3273_v30, 2 }
  0x63   : > { %5335 = vst [vmem:[#allocation36_spill] sm:$0xff] %v3508_v46 }
  0x64   : > { %433 = vrot.lane.b32.xlu1 %v3465_v42, %s3093_s29  ;;  %431 = vrot.lane.b32.xlu0 %v3472_v1, %s3093_s29  ;;  %v3520_v11 = vsel %vm378_vm1, %v394_v33, %v3511_v12  ;;  %v3532_v37 = vsel %vm378_vm1, %v397_v63, %v3523_v32  ;;  %v400_v33 = vrot.slane %v3291_v35, 2  ;;  %v403_v63 = vrot.slane %v3309_v40, 2 }
  0x65   : > { %5337 = vst [vmem:[#allocation38_spill] sm:$0xff] %v3520_v11  ;;  %5339 = vst [vmem:[#allocation40_spill] sm:$0xff] %v3532_v37 }
  0x66   : > { %v3544_v53 = vsel %vm378_vm1, %v400_v33, %v3535_v41  ;;  %v406_v33 = vrot.slane %v3327_v45, 2 }
  0x67   : > { %5341 = vst [vmem:[#allocation42_spill] sm:$0xff] %v3544_v53 }
  0x68   : > { %437 = vrot.lane.b32.xlu1 %v3475_v5, %s3093_s29  ;;  %435 = vrot.lane.b32.xlu0 %v3484_v47, %s3093_s29 }
  0x6c   : > { %441 = vrot.lane.b32.xlu1 %v3487_v51, %s3093_s29  ;;  %439 = vrot.lane.b32.xlu0 %v3496_v38, %s3093_s29 }
  0x70   : > { %445 = vrot.lane.b32.xlu1 %v3499_v58, %s3093_s29  ;;  %443 = vrot.lane.b32.xlu0 %v3508_v46, %s3093_s29 }
  0x74   : > { %449 = vrot.lane.b32.xlu1 %v3511_v12, %s3093_s29  ;;  %447 = vrot.lane.b32.xlu0 %v3520_v11, %s3093_s29  ;;  %v3547_v12 = vrot.slane %v3306_v39, 2 }
  0x76   : > { %5342 = vst [vmem:[#allocation43_spill] sm:$0xff] %v3547_v12 }
  0x78   : > { %453 = vrot.lane.b32.xlu1 %v3523_v32, %s3093_s29  ;;  %451 = vrot.lane.b32.xlu0 %v3532_v37, %s3093_s29  ;;  %v3556_v32 = vsel %vm378_vm1, %v403_v63, %v3547_v12  ;;  %v409_v63 = vrot.slane %v3345_v50, 2 }
  0x79   : > { %5343 = vst [vmem:[#allocation44_spill] sm:$0xff] %v3556_v32 }
  0x7c   : > { %457 = vrot.lane.b32.xlu1 %v3535_v41, %s3093_s29  ;;  %455 = vrot.lane.b32.xlu0 %v3544_v53, %s3093_s29  ;;  %v3568_v41 = vsel %vm378_vm1, %v406_v33, %v3559_v28  ;;  %v3571_v53 = vrot.slane %v3342_v49, 2  ;;  %v412_v33 = vrot.slane %v3363_v55, 2 }
  0x7d   : > { %5345 = vst [vmem:[#allocation46_spill] sm:$0xff] %v3568_v41 }
  0x7e   : > { %5346 = vst [vmem:[#allocation47_spill] sm:$0xff] %v3571_v53 }
  0x80   : > { %461 = vrot.lane.b32.xlu1 %v3547_v12, %s3093_s29  ;;  %459 = vrot.lane.b32.xlu0 %v3556_v32, %s3093_s29  ;;  %v3580_v12 = vsel %vm378_vm1, %v409_v63, %v3571_v53  ;;  %v3583_v32 = vrot.slane %v3360_v54, 2  ;;  %v415_v63 = vrot.slane %v3381_v60, 2 }
  0x81   : > { %5347 = vst [vmem:[#allocation48_spill] sm:$0xff] %v3580_v12 }
  0x82   : > { %5348 = vst [vmem:[#allocation49_spill] sm:$0xff] %v3583_v32 }
  0x84   : > { %465 = vrot.lane.b32.xlu1 %v3559_v28, %s3093_s29  ;;  %463 = vrot.lane.b32.xlu0 %v3568_v41, %s3093_s29  ;;  %v3592_v28 = vsel %vm378_vm1, %v412_v33, %v3583_v32  ;;  %v3595_v41 = vrot.slane %v3378_v59, 2  ;;  %v418_v33 = vrot.slane %v3399_v8, 2 }
  0x85   : > { %5349 = vst [vmem:[#allocation50_spill] sm:$0xff] %v3592_v28 }
  0x86   : > { %5350 = vst [vmem:[#allocation51_spill] sm:$0xff] %v3595_v41  ;;  %v3604_v27 = vsel %vm378_vm1, %v415_v63, %v3595_v41  ;;  %v3616_v37 = vsel %vm378_vm1, %v418_v33, %v3607_v62  ;;  %v421_v63 = vrot.slane %v3417_v23, 2  ;;  %v3635_v33 = vrot.slane %v3432_v43, 2 }
  0x87   : > { %5351 = vst [vmem:[#allocation52_spill] sm:$0xff] %v3604_v27  ;;  %5353 = vst [vmem:[#allocation54_spill] sm:$0xff] %v3616_v37 }
  0x88   : > { %469 = vrot.lane.b32.xlu1 %v3571_v53, %s3093_s29  ;;  %467 = vrot.lane.b32.xlu0 %v3580_v12, %s3093_s29  ;;  %5358 = vst [vmem:[#allocation59_spill] sm:$0xff] %v3635_v33 }
  0x8c   : > { %473 = vrot.lane.b32.xlu1 %v3583_v32, %s3093_s29  ;;  %471 = vrot.lane.b32.xlu0 %v3592_v28, %s3093_s29 }
  0x90   : > { %477 = vrot.lane.b32.xlu1 %v3595_v41, %s3093_s29  ;;  %475 = vrot.lane.b32.xlu0 %v3604_v27, %s3093_s29  ;;  %v3632_v41 = vsel %vm378_vm1, %v421_v63, %v3619_v36  ;;  %v424_v27 = vrot.slane %v3435_v48, 2 }
  0x91   : > { %5357 = vst [vmem:[#allocation58_spill] sm:$0xff] %v3632_v41 }
  0x92   : > { %v3622_v32 = vpop.permute.xlu1 %288  ;;  %v3624_v58 = vpop.permute.xlu0 %284 }
  0x93   : > { %5355 = vst [vmem:[#allocation56_spill] sm:$0xff] %v3622_v32  ;;  %5356 = vst [vmem:[#allocation57_spill] sm:$0xff] %v3624_v58 }
  0x94   : > { %481 = vrot.lane.b32.xlu1 %v3607_v62, %s3093_s29  ;;  %479 = vrot.lane.b32.xlu0 %v3616_v37, %s3093_s29  ;;  %v3648_v62 = vsel %vm378_vm1, %v424_v27, %v3635_v33 }
  0x95   : > { %5360 = vst [vmem:[#allocation61_spill] sm:$0xff] %v3648_v62 }
  0x96   : > { %v3638_v53 = vpop.permute.xlu1 %292  ;;  %v3640_v32 = vpop.permute.xlu0 %282 }
  0x97   : > { %5359 = vst [vmem:[#allocation60_spill] sm:$0xff] %v3640_v32 }
  0x98   : > { %485 = vrot.lane.b32.xlu1 %v3619_v36, %s3093_s29  ;;  %483 = vrot.lane.b32.xlu0 %v3632_v41, %s3093_s29 }
  0x9a   : > { %v3650_v63 = vpop.permute.xlu1 %286  ;;  %v3652_v58 = vpop.permute.xlu0 %290 }
  0x9b   : > { %5361 = vst [vmem:[#allocation62_spill] sm:$0xff] %v3650_v63  ;;  %5362 = vst [vmem:[#allocation63_spill] sm:$0xff] %v3652_v58 }
  0x9c   : > { %489 = vrot.lane.b32.xlu1 %v3635_v33, %s3093_s29  ;;  %487 = vrot.lane.b32.xlu0 %v3648_v62, %s3093_s29 }
  0x9e   : > { %v3658_v32 = vpop.permute.xlu1 %296  ;;  %v3660_v36 = vpop.permute.xlu0 %294 }
  0xa0   : > { %527 = vrot.lane.b32.xlu1 %v3181_v0, %s3094_s30  ;;  %525 = vrot.lane.b32.xlu0 %v3197_v6, %s3094_s30 }
  0xa2   : > { %v3666_v27 = vpop.permute.xlu1 %300  ;;  %v3668_v41 = vpop.permute.xlu0 %298 }
  0xa4   : > { %531 = vrot.lane.b32.xlu1 %v3187_v2, %s3094_s30  ;;  %529 = vrot.lane.b32.xlu0 %v3200_v7, %s3094_s30 }
  0xa6   : > { %v3674_v33 = vpop.permute.xlu1 %304  ;;  %v3676_v62 = vpop.permute.xlu0 %302 }
  0xa8   : > { %535 = vrot.lane.b32.xlu1 %v3213_v13, %s3094_s30  ;;  %533 = vrot.lane.b32.xlu0 %v3216_v14, %s3094_s30 }
  0xaa   : > { %v3682_v0 = vpop.permute.xlu1 %308  ;;  %v3684_v6 = vpop.permute.xlu0 %306 }
  0xac   : > { %539 = vrot.lane.b32.xlu1 %v3234_v19, %s3094_s30  ;;  %537 = vrot.lane.b32.xlu0 %v3237_v20, %s3094_s30 }
  0xae   : > { %v3690_v58 = vpop.permute.xlu1 %312  ;;  %v3692_v63 = vpop.permute.xlu0 %310 }
  0xb0   : > { %543 = vrot.lane.b32.xlu1 %v3252_v24, %s3094_s30  ;;  %541 = vrot.lane.b32.xlu0 %v3255_v25, %s3094_s30 }
  0xb2   : > { %v3698_v37 = vpop.permute.xlu1 %316  ;;  %v3700_v10 = vpop.permute.xlu0 %314 }
  0xb4   : > { %547 = vrot.lane.b32.xlu1 %v3270_v29, %s3094_s30  ;;  %545 = vrot.lane.b32.xlu0 %v3273_v30, %s3094_s30 }
  0xb6   : > { %v3706_v22 = vpop.permute.xlu1 %320  ;;  %v3708_v57 = vpop.permute.xlu0 %318 }
  0xb8   : > { %551 = vrot.lane.b32.xlu1 %v3288_v34, %s3094_s30  ;;  %549 = vrot.lane.b32.xlu0 %v3291_v35, %s3094_s30 }
  0xba   : > { %v3714_v28 = vpop.permute.xlu1 %324  ;;  %v3716_v11 = vpop.permute.xlu0 %322 }
  0xbc   : > { %555 = vrot.lane.b32.xlu1 %v3306_v39, %s3094_s30  ;;  %553 = vrot.lane.b32.xlu0 %v3309_v40, %s3094_s30 }
  0xbe   : > { %v3722_v52 = vpop.permute.xlu1 %328  ;;  %v3724_v61 = vpop.permute.xlu0 %326 }
  0xc0   : > { %559 = vrot.lane.b32.xlu1 %v3324_v44, %s3094_s30  ;;  %557 = vrot.lane.b32.xlu0 %v3327_v45, %s3094_s30 }
  0xc2   : > { %v3730_v12 = vpop.permute.xlu1 %332  ;;  %v3732_v31 = vpop.permute.xlu0 %330 }
  0xc4   : > { %563 = vrot.lane.b32.xlu1 %v3342_v49, %s3094_s30  ;;  %561 = vrot.lane.b32.xlu0 %v3345_v50, %s3094_s30 }
  0xc6   : > { %v3738_v46 = vpop.permute.xlu1 %336  ;;  %v3740_v56 = vpop.permute.xlu0 %334 }
  0xc7   : > { %5363 = vst [vmem:[#allocation64_spill] sm:$0xff] %v3738_v46  ;;  %5364 = vst [vmem:[#allocation65_spill] sm:$0xff] %v3740_v56 }
  0xc8   : > { %567 = vrot.lane.b32.xlu1 %v3360_v54, %s3094_s30  ;;  %565 = vrot.lane.b32.xlu0 %v3363_v55, %s3094_s30 }
  0xca   : > { %v3746_v51 = vpop.permute.xlu1 %340  ;;  %v3748_v17 = vpop.permute.xlu0 %338 }
  0xcb   : > { %5365 = vst [vmem:[#allocation66_spill] sm:$0xff] %v3746_v51  ;;  %5366 = vst [vmem:[#allocation67_spill] sm:$0xff] %v3748_v17 }
  0xcc   : > { %571 = vrot.lane.b32.xlu1 %v3378_v59, %s3094_s30  ;;  %569 = vrot.lane.b32.xlu0 %v3381_v60, %s3094_s30 }
  0xce   : > { %v3754_v26 = vpop.permute.xlu1 %344  ;;  %v3756_v56 = vpop.permute.xlu0 %342 }
  0xcf   : > { %5367 = vst [vmem:[#allocation68_spill] sm:$0xff] %v3754_v26  ;;  %5368 = vst [vmem:[#allocation69_spill] sm:$0xff] %v3756_v56  ;;  %v1121_v56 = vsel %vm1115_vm2, %v3187_v2, %v3638_v53  ;;  %v1122_v53 = vsel %vm1115_vm2, %v3216_v14, %v3660_v36  ;;  %v1124_v36 = vsel %vm1115_vm2, %v3237_v20, %v3668_v41 }
  0xd0   : > { %575 = vrot.lane.b32.xlu1 %v3396_v4, %s3094_s30  ;;  %573 = vrot.lane.b32.xlu0 %v3399_v8, %s3094_s30  ;;  %v1126_v41 = vsel %vm1115_vm2, %v3255_v25, %v3676_v62  ;;  %v1128_v62 = vsel %vm1115_vm2, %v3273_v30, %v3684_v6 }
  0xd2   : > { %v3762_v51 = vpop.permute.xlu1 %429  ;;  %v3764_v17 = vpop.permute.xlu0 %427 }
  0xd3   : > { %5369 = vst [vmem:[#allocation70_spill] sm:$0xff] %v3762_v51  ;;  %5370 = vst [vmem:[#allocation71_spill] sm:$0xff] %v3764_v17  ;;  %v3779_v51 = vld [vmem:[%s3178_s27 + $0x108] sm:$0xff]  ;;  %v3782_v17 = vld [vmem:[%s3178_s27 + $0x100] sm:$0xff] }
  0xd4   : > { %579 = vrot.lane.b32.xlu1 %v3414_v18, %s3094_s30  ;;  %577 = vrot.lane.b32.xlu0 %v3417_v23, %s3094_s30 }
  0xd6   : > { %v3770_v46 = vpop.permute.xlu1 %433  ;;  %v3772_v26 = vpop.permute.xlu0 %431 }
  0xd7   : > { %5371 = vst [vmem:[#allocation72_spill] sm:$0xff] %v3770_v46  ;;  %5372 = vst [vmem:[#allocation73_spill] sm:$0xff] %v3772_v26 }
  0xd8   : > { %583 = vrot.lane.b32.xlu1 %v3432_v43, %s3094_s30  ;;  %581 = vrot.lane.b32.xlu0 %v3435_v48, %s3094_s30  ;;  %v1123_v48 = vsel %vm1115_vm2, %v3213_v13, %v3658_v32  ;;  %v1125_v32 = vsel %vm1115_vm2, %v3234_v19, %v3666_v27 }
  0xda   : > { %v438_v23 = vpop.permute.xlu1 %437  ;;  %v3787_v46 = vpop.permute.xlu0 %435 }
  0xdb   : > { %5373 = vst [vmem:[#allocation74_spill] sm:$0xff] %v3787_v46  ;;  %v3790_v26 = vsel %vm1148_vm3, %v1121_v56, %v438_v23 }
  0xdc   : > { %587 = vrot.lane.b32.xlu1 %v3779_v51, %s3094_s30  ;;  %585 = vrot.lane.b32.xlu0 %v3782_v17, %s3094_s30  ;;  %s3018_s30 = scalar_lea.vmem %s3017_s28, 7168 }
  0xde   : > { %v442_v43 = vpop.permute.xlu1 %441  ;;  %v440_v18 = vpop.permute.xlu0 %439 }
  0xdf   : > { %v3803_v46 = vsel %vm1148_vm3, %v1123_v48, %v442_v43  ;;  %v3806_v56 = vsel %vm1148_vm3, %v1122_v53, %v440_v18 }
  0xe0   : > { %628 = vrot.lane.b32.xlu1 %v3227_v16, %s3095_s3  ;;  %624 = vrot.lane.b32.xlu0 %v3223_v15, %s3095_s3  ;;  %v1127_v15 = vsel %vm1115_vm2, %v3252_v24, %v3674_v33 }
  0xe2   : > { %v446_v23 = vpop.permute.xlu1 %445  ;;  %v444_v43 = vpop.permute.xlu0 %443 }
  0xe3   : > { %v3819_v18 = vsel %vm1148_vm3, %v1125_v32, %v446_v23  ;;  %v3822_v48 = vsel %vm1148_vm3, %v1124_v36, %v444_v43 }
  0xe4   : > { %626 = vrot.lane.b32.xlu1 %v3190_v3, %s3095_s3  ;;  %723 = vrot.lane.b32.xlu0 %v3472_v1, %s3096_s4  ;;  %v1129_v3 = vsel %vm1115_vm2, %v3270_v29, %v3682_v0  ;;  %v1130_v29 = vsel %vm1115_vm2, %v3291_v35, %v3692_v63  ;;  %v1132_v35 = vsel %vm1115_vm2, %v3309_v40, %v3700_v10 }
  0xe6   : > { %v450_v27 = vpop.permute.xlu1 %449  ;;  %v448_v53 = vpop.permute.xlu0 %447 }
  0xe7   : > { %v3835_v32 = vsel %vm1148_vm3, %v1127_v15, %v450_v27  ;;  %v3838_v36 = vsel %vm1148_vm3, %v1126_v41, %v448_v53  ;;  %v2983_v27 = vld [vmem:[%s5196_s1] sm:$0xff]  }
  0xe8   : > { %821 = vrot.lane.b32.xlu1 %v3200_v7, %s3097_s5  ;;  %727 = vrot.lane.b32.xlu0 %v3484_v47, %s3096_s4  ;;  %v1131_v7 = vsel %vm1115_vm2, %v3288_v34, %v3690_v58  ;;  %v1133_v34 = vsel %vm1115_vm2, %v3306_v39, %v3698_v37  ;;  %v1135_v37 = vsel %vm1115_vm2, %v3324_v44, %v3706_v22 }
  0xe9   : > { %2855 = vmatprep.subr.bf16.mxu0 %v2983_v27  ;;  %2899 = vmatprep.subr.bf16.mxu1 %v2983_v27  ;;  %v1134_v39 = vsel %vm1115_vm2, %v3327_v45, %v3708_v57  ;;  %v1137_v22 = vsel %vm1115_vm2, %v3342_v49, %v3714_v28  ;;  %v1136_v44 = vsel %vm1115_vm2, %v3345_v50, %v3716_v11 }
  0xea   : > { %v454_v1 = vpop.permute.xlu1 %453  ;;  %v452_v33 = vpop.permute.xlu0 %451  ;;  %2856 = vmatpush3.bf16.msra.mxu0 %v2983_v27  ;;  %2907 = vmatpush3.bf16.msra.mxu1 %v2983_v27  ;;  %v1139_v49 = vsel %vm1115_vm2, %v3360_v54, %v3722_v52  ;;  %v1138_v50 = vsel %vm1115_vm2, %v3363_v55, %v3724_v61  ;;  %v1141_v52 = vsel %vm1115_vm2, %v3378_v59, %v3730_v12  ;;  %v5374_v12 = vld [vmem:[#allocation64_spill] sm:$0xff]  ;;  %v5375_v27 = vld [vmem:[#allocation65_spill] sm:$0xff] }
  0xeb   : > { %v3851_v23 = vsel %vm1148_vm3, %v1129_v3, %v454_v1  ;;  %v3854_v43 = vsel %vm1148_vm3, %v1128_v62, %v452_v33  ;;  %v2986_v33 = vld [vmem:[%s5196_s1 + $0x18] sm:$0xff]   ;;  %v1140_v61 = vsel %vm1115_vm2, %v3381_v60, %v3732_v31  ;;  %v2988_v31 = vld [vmem:[%s5196_s1 + $0x28] sm:$0xff]  }
  0xec   : > { %632 = vrot.lane.b32.xlu1 %v3245_v21, %s3095_s3  ;;  %630 = vrot.lane.b32.xlu0 %v3207_v9, %s3095_s3 }
  0xee   : > { %v458_v0 = vpop.permute.xlu1 %457  ;;  %v456_v6 = vpop.permute.xlu0 %455 }
  0xef   : > { %v3867_v15 = vsel %vm1148_vm3, %v1131_v7, %v458_v0  ;;  %v3870_v41 = vsel %vm1148_vm3, %v1130_v29, %v456_v6  ;;  %v1143_v6 = vsel %vm1115_vm2, %v3396_v4, %v5374_v12  ;;  %v5377_v4 = vld [vmem:[#allocation5_spill] sm:$0xff] }
  0xf0   : > { %825 = vrot.lane.b32.xlu1 %v3216_v14, %s3097_s5  ;;  %725 = vrot.lane.b32.xlu0 %v3465_v42, %s3096_s4  ;;  %v2984_v42 = vld [vmem:[%s5196_s1 + $0x8] sm:$0xff]  }
  0xf1   : > { %2857 = vmatprep.subr.bf16.mxu0 %v2984_v42  ;;  %2900 = vmatprep.subr.bf16.mxu1 %v2984_v42 }
  0xf2   : > { %v462_v58 = vpop.permute.xlu1 %461  ;;  %v460_v63 = vpop.permute.xlu0 %459  ;;  %2858 = vmatpush3.bf16.msra.mxu0 %v2984_v42  ;;  %2908 = vmatpush3.bf16.msra.mxu1 %v2984_v42  ;;  %v2989_v42 = vld [vmem:[%s5196_s1 + $0x30] sm:$0xff]  }
  0xf3   : > { %v3886_v53 = vsel %vm1148_vm3, %v1133_v34, %v462_v58  ;;  %v3889_v14 = vsel %vm1148_vm3, %v1132_v35, %v460_v63  ;;  %v1142_v34 = vsel %vm1115_vm2, %v3399_v8, %v5375_v27  ;;  %v5376_v63 = vld [vmem:[#allocation7_spill] sm:$0xff]  ;;  %v5388_v27 = vld [vmem:[#allocation36_spill] sm:$0xff] }
  0xf4   : > { %729 = vrot.lane.b32.xlu1 %v3475_v5, %s3096_s4  ;;  %920 = vrot.lane.b32.xlu0 %v3227_v16, %s3098_s16  ;;  %v2985_v16 = vld [vmem:[%s5196_s1 + $0x10] sm:$0xff]  }
  0xf5   : > { %2859 = vmatprep.subr.bf16.mxu0 %v2985_v16  ;;  %2901 = vmatprep.subr.bf16.mxu1 %v2985_v16 }
  0xf6   : > { %v466_v40 = vpop.permute.xlu1 %465  ;;  %v464_v10 = vpop.permute.xlu0 %463  ;;  %2860 = vmatpush3.bf16.msra.mxu0 %v2985_v16  ;;  %2909 = vmatpush3.bf16.msra.mxu1 %v2985_v16  ;;  %v5381_v16 = vld [vmem:[#allocation26_spill] sm:$0xff] }
  0xf7   : > { %v3905_v3 = vsel %vm1148_vm3, %v1135_v37, %v466_v40  ;;  %v3908_v62 = vsel %vm1148_vm3, %v1134_v39, %v464_v10  ;;  %2861 = vmatprep.subr.bf16.mxu0 %v2986_v33  ;;  %2902 = vmatprep.subr.bf16.mxu1 %v2986_v33  ;;  %v5378_v37 = vld [vmem:[#allocation66_spill] sm:$0xff]  ;;  %v5379_v39 = vld [vmem:[#allocation25_spill] sm:$0xff]  ;;  %v5380_v10 = vld [vmem:[#allocation67_spill] sm:$0xff] }
  0xf8   : > { %823 = vrot.lane.b32.xlu1 %v3187_v2, %s3097_s5  ;;  %731 = vrot.lane.b32.xlu0 %v3496_v38, %s3096_s4  ;;  %v1145_v40 = vsel %vm1115_vm2, %v5379_v39, %v5378_v37  ;;  %v5390_v39 = vld [vmem:[#allocation48_spill] sm:$0xff] }
  0xfa   : > { %v470_v45 = vpop.permute.xlu1 %469  ;;  %v468_v57 = vpop.permute.xlu0 %467  ;;  %2862 = vmatpush3.bf16.msra.mxu0 %v2986_v33  ;;  %2910 = vmatpush3.bf16.msra.mxu1 %v2986_v33 }
  0xfb   : > { %v3924_v1 = vsel %vm1148_vm3, %v1137_v22, %v470_v45  ;;  %v3927_v2 = vsel %vm1148_vm3, %v1136_v44, %v468_v57  ;;  %v1144_v22 = vsel %vm1115_vm2, %v5381_v16, %v5380_v10 }
  0xfc   : > { %1019 = vrot.lane.b32.xlu1 %v3484_v47, %s3099_s25  ;;  %924 = vrot.lane.b32.xlu0 %v3245_v21, %s3098_s16  ;;  %v2987_v21 = vld [vmem:[%s5196_s1 + $0x20] sm:$0xff]  }
  0xfd   : > { %2863 = vmatprep.subr.bf16.mxu0 %v2987_v21  ;;  %2903 = vmatprep.subr.bf16.mxu1 %v2987_v21 }
  0xfe   : > { %v474_v11 = vpop.permute.xlu1 %473  ;;  %v472_v28 = vpop.permute.xlu0 %471  ;;  %2864 = vmatpush3.bf16.msra.mxu0 %v2987_v21  ;;  %2911 = vmatpush3.bf16.msra.mxu1 %v2987_v21 }
  0xff   : > { %v3943_v7 = vsel %vm1148_vm3, %v1139_v49, %v474_v11  ;;  %v3946_v47 = vsel %vm1148_vm3, %v1138_v50, %v472_v28  ;;  %2865 = vmatprep.subr.bf16.mxu0 %v2988_v31  ;;  %2904 = vmatprep.subr.bf16.mxu1 %v2988_v31  ;;  %v5382_v49 = vld [vmem:[#allocation34_spill] sm:$0xff]  ;;  %v2990_v50 = vld [vmem:[%s5196_s1 + $0x38] sm:$0xff]   ;;  %v5384_v28 = vld [vmem:[#allocation29_spill] sm:$0xff] }
 0x100   : > { %829 = vrot.lane.b32.xlu1 %v3237_v20, %s3097_s5  ;;  %827 = vrot.lane.b32.xlu0 %v3213_v13, %s3097_s5  ;;  %v5383_v11 = vld [vmem:[#allocation68_spill] sm:$0xff] }
 0x101   : > { %v1147_v21 = vsel %vm1115_vm2, %v5384_v28, %v5383_v11  ;;  %v5393_v28 = vld [vmem:[#allocation38_spill] sm:$0xff] }
 0x102   : > { %v478_v29 = vpop.permute.xlu1 %477  ;;  %v476_v0 = vpop.permute.xlu0 %475  ;;  %2866 = vmatpush3.bf16.msra.mxu0 %v2988_v31  ;;  %2912 = vmatpush3.bf16.msra.mxu1 %v2988_v31 }
 0x103   : > { %v3962_v20 = vsel %vm1148_vm3, %v1141_v52, %v478_v29  ;;  %v3965_v13 = vsel %vm1148_vm3, %v1140_v61, %v476_v0  ;;  %2867 = vmatprep.subr.bf16.mxu0 %v2989_v42  ;;  %2905 = vmatprep.subr.bf16.mxu1 %v2989_v42  ;;  %v5385_v52 = vld [vmem:[#allocation69_spill] sm:$0xff]  ;;  %v5386_v61 = vld [vmem:[#allocation30_spill] sm:$0xff] }
 0x104   : > { %1023 = vrot.lane.b32.xlu1 %v3496_v38, %s3099_s25  ;;  %922 = vrot.lane.b32.xlu0 %v3207_v9, %s3098_s16  ;;  %v1146_v29 = vsel %vm1115_vm2, %v5386_v61, %v5385_v52 }
 0x106   : > { %v482_v35 = vpop.permute.xlu1 %481  ;;  %v480_v58 = vpop.permute.xlu0 %479  ;;  %2868 = vmatpush3.bf16.msra.mxu0 %v2989_v42  ;;  %2913 = vmatpush3.bf16.msra.mxu1 %v2989_v42 }
 0x107   : > { %v3981_v38 = vsel %vm1148_vm3, %v1143_v6, %v482_v35  ;;  %v3984_v9 = vsel %vm1148_vm3, %v1142_v34, %v480_v58  ;;  %2869 = vmatprep.subr.bf16.mxu0 %v2990_v50  ;;  %2906 = vmatprep.subr.bf16.mxu1 %v2990_v50  ;;  %v5387_v6 = vld [vmem:[#allocation19_spill] sm:$0xff]  ;;  %v5389_v58 = vld [vmem:[#allocation9_spill] sm:$0xff] }
 0x108   : > { %928 = vrot.lane.b32.xlu1 %v5376_v63, %s3098_s16  ;;  %926 = vrot.lane.b32.xlu0 %v5377_v4, %s3098_s16 }
 0x10a   : > { %v486_v44 = vpop.permute.xlu1 %485  ;;  %v484_v45 = vpop.permute.xlu0 %483  ;;  %2870 = vmatpush3.bf16.msra.mxu0 %v2990_v50  ;;  %2914 = vmatpush3.bf16.msra.mxu1 %v2990_v50 }
 0x10b   : > { %v4000_v57 = vsel %vm1148_vm3, %v1145_v40, %v486_v44  ;;  %v4003_v33 = vsel %vm1148_vm3, %v1144_v22, %v484_v45  ;;  %v5391_v40 = vld [vmem:[#allocation21_spill] sm:$0xff] }
 0x10c   : > { %1025 = vrot.lane.b32.xlu1 %v5382_v49, %s3099_s25  ;;  %1021 = vrot.lane.b32.xlu0 %v3475_v5, %s3099_s25 }
 0x10e   : > { %v490_v0 = vpop.permute.xlu1 %489  ;;  %v488_v31 = vpop.permute.xlu0 %487 }
 0x10f   : > { %v4019_v12 = vsel %vm1148_vm3, %v1147_v21, %v490_v0  ;;  %v4022_v5 = vsel %vm1148_vm3, %v1146_v29, %v488_v31  ;;  %v5397_v0 = vld [vmem:[#allocation20_spill] sm:$0xff] }
 0x110   : > { %660 = vrot.lane.b32.xlu1 %v5387_v6, %s3095_s3  ;;  %1027 = vrot.lane.b32.xlu0 %v5388_v27, %s3099_s25 }
 0x112   : > { %v4028_v34 = vpop.permute.xlu1 %527  ;;  %v4030_v35 = vpop.permute.xlu0 %525 }
 0x114   : > { %640 = vrot.lane.b32.xlu1 %v5389_v58, %s3095_s3  ;;  %636 = vrot.lane.b32.xlu0 %v5376_v63, %s3095_s3  ;;  %v5392_v63 = vld [vmem:[#allocation18_spill] sm:$0xff] }
 0x116   : > { %v4036_v42 = vpop.permute.xlu1 %531  ;;  %v4038_v37 = vpop.permute.xlu0 %529 }
 0x118   : > { %759 = vrot.lane.b32.xlu1 %v5390_v39, %s3096_s4  ;;  %664 = vrot.lane.b32.xlu0 %v5391_v40, %s3095_s3  ;;  %v5449_v39 = vld [vmem:[#allocation14_spill] sm:$0xff] }
 0x11a   : > { %v536_v10 = vpop.permute.xlu1 %535  ;;  %v4044_v16 = vpop.permute.xlu0 %533 }
 0x11b   : > { %v4048_v22 = vsel %vm1181_vm4, %v3790_v26, %v536_v10 }
 0x11c   : > { %662 = vrot.lane.b32.xlu1 %v5392_v63, %s3095_s3  ;;  %634 = vrot.lane.b32.xlu0 %v5377_v4, %s3095_s3 }
 0x11e   : > { %v540_v44 = vpop.permute.xlu1 %539  ;;  %v538_v45 = vpop.permute.xlu0 %537 }
 0x11f   : > { %v4056_v50 = vsel %vm1181_vm4, %v3803_v46, %v540_v44  ;;  %v4060_v11 = vsel %vm1181_vm4, %v3806_v56, %v538_v45  ;;  %v5395_v56 = vld [vmem:[#allocation50_spill] sm:$0xff] }
 0x120   : > { %739 = vrot.lane.b32.xlu1 %v5393_v28, %s3096_s4  ;;  %735 = vrot.lane.b32.xlu0 %v5388_v27, %s3096_s4 }
 0x122   : > { %v544_v26 = vpop.permute.xlu1 %543  ;;  %v542_v21 = vpop.permute.xlu0 %541 }
 0x123   : > { %v4068_v4 = vsel %vm1181_vm4, %v3819_v18, %v544_v26  ;;  %v4072_v46 = vsel %vm1181_vm4, %v3822_v48, %v542_v21  ;;  %v5398_v48 = vld [vmem:[#allocation6_spill] sm:$0xff] }
 0x124   : > { %5394 = vst [vmem:[#allocation64_spill] sm:$0xff] %v4068_v4  ;;  %857 = vrot.lane.b32.xlu1 %v3363_v55, %s3097_s5  ;;  %763 = vrot.lane.b32.xlu0 %v5395_v56, %s3096_s4 }
 0x126   : > { %v548_v52 = vpop.permute.xlu1 %547  ;;  %v546_v61 = vpop.permute.xlu0 %545 }
 0x127   : > { %v4080_v29 = vsel %vm1181_vm4, %v3835_v32, %v548_v52  ;;  %v4084_v18 = vsel %vm1181_vm4, %v3838_v36, %v546_v61  ;;  %v5400_v36 = vld [vmem:[#allocation23_spill] sm:$0xff] }
 0x128   : > { %5396 = vst [vmem:[#allocation65_spill] sm:$0xff] %v4080_v29  ;;  %666 = vrot.lane.b32.xlu1 %v5397_v0, %s3095_s3  ;;  %638 = vrot.lane.b32.xlu0 %v5398_v48, %s3095_s3  ;;  %v5406_v61 = vld [vmem:[#allocation35_spill] sm:$0xff] }
 0x12a   : > { %v552_v55 = vpop.permute.xlu1 %551  ;;  %v550_v31 = vpop.permute.xlu0 %549 }
 0x12b   : > { %v4092_v27 = vsel %vm1181_vm4, %v3851_v23, %v552_v55  ;;  %v4096_v32 = vsel %vm1181_vm4, %v3854_v43, %v550_v31  ;;  %v5403_v43 = vld [vmem:[#allocation47_spill] sm:$0xff]  ;;  %v5407_v55 = vld [vmem:[#allocation52_spill] sm:$0xff] }
 0x12c   : > { %5399 = vst [vmem:[#allocation7_spill] sm:$0xff] %v4092_v27  ;;  %733 = vrot.lane.b32.xlu1 %v5382_v49, %s3096_s4  ;;  %668 = vrot.lane.b32.xlu0 %v5400_v36, %s3095_s3 }
 0x12e   : > { %v556_v10 = vpop.permute.xlu1 %555  ;;  %v554_v44 = vpop.permute.xlu0 %553 }
 0x12f   : > { %v4104_v45 = vsel %vm1181_vm4, %v3867_v15, %v556_v10  ;;  %v4108_v23 = vsel %vm1181_vm4, %v3870_v41, %v554_v44 }
 0x130   : > { %5401 = vst [vmem:[#allocation5_spill] sm:$0xff] %v4104_v45  ;;  %5402 = vst [vmem:[#allocation66_spill] sm:$0xff] %v4108_v23  ;;  %833 = vrot.lane.b32.xlu1 %v3255_v25, %s3097_s5  ;;  %761 = vrot.lane.b32.xlu0 %v5403_v43, %s3096_s4  ;;  %v5446_v23 = vld [vmem:[#allocation61_spill] sm:$0xff] }
 0x132   : > { %v560_v49 = vpop.permute.xlu1 %559  ;;  %v558_v26 = vpop.permute.xlu0 %557 }
 0x133   : > { %v4116_v21 = vsel %vm1181_vm4, %v3886_v53, %v560_v49  ;;  %v4120_v15 = vsel %vm1181_vm4, %v3889_v14, %v558_v26  ;;  %v5410_v26 = vld [vmem:[#allocation11_spill] sm:$0xff] }
 0x134   : > { %5404 = vst [vmem:[#allocation25_spill] sm:$0xff] %v4116_v21  ;;  %5405 = vst [vmem:[#allocation67_spill] sm:$0xff] %v4120_v15  ;;  %861 = vrot.lane.b32.xlu1 %v3381_v60, %s3097_s5  ;;  %837 = vrot.lane.b32.xlu0 %v3273_v30, %s3097_s5 }
 0x136   : > { %v564_v25 = vpop.permute.xlu1 %563  ;;  %v562_v41 = vpop.permute.xlu0 %561 }
 0x137   : > { %v4128_v52 = vsel %vm1181_vm4, %v3905_v3, %v564_v25  ;;  %v4132_v53 = vsel %vm1181_vm4, %v3908_v62, %v562_v41  ;;  %v5408_v62 = vld [vmem:[#allocation49_spill] sm:$0xff]  ;;  %v5417_v41 = vld [vmem:[#allocation22_spill] sm:$0xff] }
 0x138   : > { %737 = vrot.lane.b32.xlu1 %v5406_v61, %s3096_s4  ;;  %956 = vrot.lane.b32.xlu0 %v5391_v40, %s3098_s16 }
 0x13a   : > { %v568_v60 = vpop.permute.xlu1 %567  ;;  %v566_v14 = vpop.permute.xlu0 %565 }
 0x13b   : > { %v4140_v30 = vsel %vm1181_vm4, %v3924_v1, %v568_v60  ;;  %v4144_v3 = vsel %vm1181_vm4, %v3927_v2, %v566_v14  ;;  %v5419_v14 = vld [vmem:[#allocation27_spill] sm:$0xff] }
 0x13c   : > { %767 = vrot.lane.b32.xlu1 %v5407_v55, %s3096_s4  ;;  %765 = vrot.lane.b32.xlu0 %v5408_v62, %s3096_s4 }
 0x13e   : > { %v572_v31 = vpop.permute.xlu1 %571  ;;  %v570_v10 = vpop.permute.xlu0 %569 }
 0x13f   : > { %v4152_v40 = vsel %vm1181_vm4, %v3943_v7, %v572_v31  ;;  %v4156_v1 = vsel %vm1181_vm4, %v3946_v47, %v570_v10  ;;  %v5420_v10 = vld [vmem:[#allocation37_spill] sm:$0xff] }
 0x140   : > { %859 = vrot.lane.b32.xlu1 %v3360_v54, %s3097_s5  ;;  %831 = vrot.lane.b32.xlu0 %v3234_v19, %s3097_s5 }
 0x142   : > { %v576_v2 = vpop.permute.xlu1 %575  ;;  %v574_v44 = vpop.permute.xlu0 %573 }
 0x143   : > { %v4164_v49 = vsel %vm1181_vm4, %v3962_v20, %v576_v2  ;;  %v4168_v7 = vsel %vm1181_vm4, %v3965_v13, %v574_v44 }
 0x144   : > { %5409 = vst [vmem:[#allocation26_spill] sm:$0xff] %v4164_v49  ;;  %936 = vrot.lane.b32.xlu1 %v5410_v26, %s3098_s16  ;;  %932 = vrot.lane.b32.xlu0 %v5389_v58, %s3098_s16 }
 0x146   : > { %v580_v54 = vpop.permute.xlu1 %579  ;;  %v578_v47 = vpop.permute.xlu0 %577 }
 0x147   : > { %v4176_v19 = vsel %vm1181_vm4, %v3981_v38, %v580_v54  ;;  %v4180_v20 = vsel %vm1181_vm4, %v3984_v9, %v578_v47  ;;  %v5421_v54 = vld [vmem:[#allocation54_spill] sm:$0xff]  ;;  %v2991_v47 = vld [vmem:[%s3178_s27] sm:$0xff] }
 0x148   : > { %5411 = vst [vmem:[#allocation34_spill] sm:$0xff] %v4176_v19  ;;  %1055 = vrot.lane.b32.xlu1 %v5395_v56, %s3099_s25  ;;  %960 = vrot.lane.b32.xlu0 %v5400_v36, %s3098_s16 }
 0x14a   : > { %v584_v13 = vpop.permute.xlu1 %583  ;;  %v582_v25 = vpop.permute.xlu0 %581 }
 0x14b   : > { %v4188_v58 = vsel %vm1181_vm4, %v4000_v57, %v584_v13  ;;  %v4192_v38 = vsel %vm1181_vm4, %v4003_v33, %v582_v25  ;;  %v5423_v13 = vld [vmem:[#allocation60_spill] sm:$0xff] }
 0x14c   : > { %5412 = vst [vmem:[#allocation68_spill] sm:$0xff] %v4188_v58  ;;  %5413 = vst [vmem:[#allocation29_spill] sm:$0xff] %v4192_v38  ;;  %863 = vrot.lane.b32.xlu1 %v3378_v59, %s3097_s5  ;;  %835 = vrot.lane.b32.xlu0 %v3252_v24, %s3097_s5  ;;  %v1116_v25 = vsel %vm1115_vm2, %v2991_v47, %v5423_v13  ;;  %v3100_v13 = vmov 1983009808  }
 0x14e   : > { %v588_v9 = vpop.permute.xlu1 %587  ;;  %v586_v56 = vpop.permute.xlu0 %585 }
 0x14f   : > { %v4200_v36 = vsel %vm1181_vm4, %v4019_v12, %v588_v9  ;;  %v4204_v57 = vsel %vm1181_vm4, %v4022_v5, %v586_v56  ;;  %v5416_v5 = vld [vmem:[#allocation40_spill] sm:$0xff]  ;;  %v5424_v9 = vld [vmem:[#allocation71_spill] sm:$0xff] }
 0x150   : > { %5414 = vst [vmem:[#allocation69_spill] sm:$0xff] %v4200_v36  ;;  %5415 = vst [vmem:[#allocation30_spill] sm:$0xff] %v4204_v57  ;;  %930 = vrot.lane.b32.xlu1 %v5398_v48, %s3098_s16  ;;  %865 = vrot.lane.b32.xlu0 %v3399_v8, %s3097_s5  ;;  %v1149_v56 = vsel %vm1148_vm3, %v1116_v25, %v5424_v9  ;;  %v1446_v25 = vunpack.c.l.s4 %v3100_v13  ;;  %v1448_v9 = vlaneseq }
 0x151   : > { %v1182_v36 = vsel %vm1181_vm4, %v1149_v56, %v4030_v35 }
 0x152   : > { %v629_v59 = vpop.permute.xlu1 %628  ;;  %v625_v33 = vpop.permute.xlu0 %624  ;;  %v1449_v13 = vshrl.u32 %v1448_v9, 7 }
 0x153   : > { %v1215_v45 = vsel %vm1214_vm5, %v1182_v36, %v625_v33  ;;  %v2992_v36 = vld [vmem:[%s3178_s27 + $0x10] sm:$0xff]  ;;  %v5425_v33 = vld [vmem:[#allocation62_spill] sm:$0xff] }
 0x154   : > { %1031 = vrot.lane.b32.xlu1 %v5393_v28, %s3099_s25  ;;  %958 = vrot.lane.b32.xlu0 %v5397_v0, %s3098_s16  ;;  %v5418_v28 = vld [vmem:[#allocation8_spill] sm:$0xff]  ;;  %v1118_v19 = vsel %vm1115_vm2, %v2992_v36, %v5425_v33 }
 0x156   : > { %v4214_v24 = vpop.permute.xlu1 %626  ;;  %v724_v12 = vpop.permute.xlu0 %723 }
 0x157   : > { %v1248_v47 = vsel %vm1247_vm6, %v1215_v45, %v724_v12  ;;  %v5427_v45 = vld [vmem:[#allocation13_spill] sm:$0xff] }
 0x158   : > { %1059 = vrot.lane.b32.xlu1 %v5407_v55, %s3099_s25  ;;  %1035 = vrot.lane.b32.xlu0 %v5416_v5, %s3099_s25  ;;  %v5428_v12 = vld [vmem:[#allocation73_spill] sm:$0xff] }
 0x15a   : > { %v822_v48 = vpop.permute.xlu1 %821  ;;  %v728_v8 = vpop.permute.xlu0 %727 }
 0x15b   : > { %v1281_v58 = vsel %vm1280_vm7, %v1248_v47, %v822_v48  ;;  %v1151_v48 = vsel %vm1148_vm3, %v1118_v19, %v5428_v12  ;;  %v1447_v47 = vunpack.c.0.s8 %v1446_v25 }
 0x15c   : > { %962 = vrot.lane.b32.xlu1 %v5417_v41, %s3098_s16  ;;  %934 = vrot.lane.b32.xlu0 %v5418_v28, %s3098_s16 }
 0x15d   : > { %v4285_v25 = vsub.s32 %v1447_v47, %v1449_v13  ;;  %v5432_v13 = vld [vmem:[#allocation72_spill] sm:$0xff] }
 0x15e   : > { %v4224_v60 = vpop.permute.xlu1 %632  ;;  %v4226_v0 = vpop.permute.xlu0 %630 }
 0x160   : > { %1029 = vrot.lane.b32.xlu1 %v5406_v61, %s3099_s25  ;;  %964 = vrot.lane.b32.xlu0 %v5419_v14, %s3098_s16  ;;  %v5422_v61 = vld [vmem:[#allocation51_spill] sm:$0xff] }
 0x162   : > { %v826_v55 = vpop.permute.xlu1 %825  ;;  %v4232_v31 = vpop.permute.xlu0 %725 }
 0x164   : > { %1033 = vrot.lane.b32.xlu1 %v5420_v10, %s3099_s25  ;;  %1057 = vrot.lane.b32.xlu0 %v5408_v62, %s3099_s25 }
 0x166   : > { %v4238_v2 = vpop.permute.xlu1 %729  ;;  %v921_v44 = vpop.permute.xlu0 %920 }
 0x167   : > { %v1314_v56 = vsel %vm1313_vm8, %v1281_v58, %v921_v44  ;;  %v1184_v58 = vsel %vm1181_vm4, %v1151_v48, %v4038_v37 }
 0x168   : > { %1063 = vrot.lane.b32.xlu1 %v5421_v54, %s3099_s25  ;;  %1061 = vrot.lane.b32.xlu0 %v5422_v61, %s3099_s25 }
 0x16a   : > { %v4249_v21 = vpop.permute.xlu1 %823  ;;  %v4251_v62 = vpop.permute.xlu0 %731 }
 0x16c   : > { %672 = vrot.lane.b32.xlu1 %v5419_v14, %s3095_s3  ;;  %644 = vrot.lane.b32.xlu0 %v5410_v26, %s3095_s3  ;;  %v5426_v26 = vld [vmem:[#allocation31_spill] sm:$0xff] }
 0x16e   : > { %v1020_v57 = vpop.permute.xlu1 %1019  ;;  %v925_v35 = vpop.permute.xlu0 %924 }
 0x16f   : > { %v1347_v14 = vsel %vm1346_vm9, %v1314_v56, %v1020_v57  ;;  %v1217_v57 = vsel %vm1214_vm5, %v1184_v58, %v629_v59 }
 0x170   : > { %676 = vrot.lane.b32.xlu1 %v5426_v26, %s3095_s3  ;;  %648 = vrot.lane.b32.xlu0 %v5427_v45, %s3095_s3  ;;  %v1380_v56 = vsel %vm1379_vm10, %v1347_v14, 0.0  ;;  %v1250_v33 = vsel %vm1247_vm6, %v1217_v57, %v728_v8  ;;  %v2993_v14 = vld [vmem:[%s3178_s27 + $0x18] sm:$0xff]  ;;  %v5430_v57 = vld [vmem:[#allocation57_spill] sm:$0xff] }
 0x171   : > { %v1283_v19 = vsel %vm1280_vm7, %v1250_v33, %v826_v55  ;;  %v1444_v37 = vcombine.high %v1380_v56, %v1380_v56  ;;  %v5429_v8 = vld [vmem:[#allocation56_spill] sm:$0xff] }
 0x172   : > { %v4275_v44 = vpop.permute.xlu1 %829  ;;  %v828_v36 = vpop.permute.xlu0 %827  ;;  %v1316_v9 = vsel %vm1313_vm8, %v1283_v19, %v925_v35  ;;  %v1119_v58 = vsel %vm1115_vm2, %v2993_v14, %v5429_v8  ;;  %v5431_v35 = vld [vmem:[#allocation70_spill] sm:$0xff]  ;;  %v1451_v19 = vrot.slane %v1380_v56, %v4285_v25  ;;  %v2995_v8 = vld [vmem:[%s3178_s27 + $0x20] sm:$0xff] }
 0x173   : > { %v1152_v33 = vsel %vm1148_vm3, %v1119_v58, %v5432_v13 }
 0x174   : > { %771 = vrot.lane.b32.xlu1 %v5421_v54, %s3096_s4  ;;  %743 = vrot.lane.b32.xlu0 %v5416_v5, %s3096_s4  ;;  %v2994_v54 = vld [vmem:[%s3178_s27 + $0x8] sm:$0xff]  ;;  %v1459_v13 = vcombine.high %v1451_v19, %v1451_v19 }
 0x175   : > { %v1117_v5 = vsel %vm1115_vm2, %v2994_v54, %v5430_v57 }
 0x176   : > { %v1024_v12 = vpop.permute.xlu1 %1023  ;;  %v923_v48 = vpop.permute.xlu0 %922  ;;  %v1150_v47 = vsel %vm1148_vm3, %v1117_v5, %v5431_v35  ;;  %v5434_v5 = vld [vmem:[#allocation74_spill] sm:$0xff] }
 0x177   : > { %v1349_v59 = vsel %vm1346_vm9, %v1316_v9, %v1024_v12  ;;  %v1183_v9 = vsel %vm1181_vm4, %v1150_v47, %v4028_v34  ;;  %v1185_v12 = vsel %vm1181_vm4, %v1152_v33, %v4036_v42  ;;  %v5435_v35 = vld [vmem:[#allocation58_spill] sm:$0xff] }
 0x178   : > { %v1382_v55 = vsel %vm1379_vm10, %v1349_v59, 0.0  ;;  %670 = vrot.lane.b32.xlu1 %v5417_v41, %s3095_s3  ;;  %642 = vrot.lane.b32.xlu0 %v5418_v28, %s3095_s3  ;;  %v1458_v59 = vrot.slane %v1444_v37, %v4285_v25  ;;  %v5433_v28 = vld [vmem:[#allocation63_spill] sm:$0xff]  ;;  %v1216_v57 = vsel %vm1214_vm5, %v1183_v9, %v4214_v24  ;;  %v1218_v56 = vsel %vm1214_vm5, %v1185_v12, %v4226_v0  ;;  %v5436_v47 = vld [vmem:[#allocation42_spill] sm:$0xff] }
 0x179   : > { %v1120_v54 = vsel %vm1115_vm2, %v2995_v8, %v5433_v28  ;;  %v1477_v58 = vcombine.high %v1382_v55, %v1382_v55  ;;  %v1249_v42 = vsel %vm1247_vm6, %v1216_v57, %v4232_v31  ;;  %v1251_v37 = vsel %vm1247_vm6, %v1218_v56, %v4238_v2  ;;  %v2996_v56 = vld [vmem:[%s3178_s27 + $0xe0] sm:$0xff] }
 0x17a   : > { %v929_v41 = vpop.permute.xlu1 %928  ;;  %v927_v14 = vpop.permute.xlu0 %926  ;;  %v1153_v34 = vsel %vm1148_vm3, %v1120_v54, %v5434_v5  ;;  %v1282_v0 = vsel %vm1280_vm7, %v1249_v42, %v4249_v21  ;;  %v1284_v33 = vsel %vm1280_vm7, %v1251_v37, %v828_v36  ;;  %v1460_v31 = vcombine.high %v1458_v59, %v1458_v59 }
 0x17b   : > { %v1186_v24 = vsel %vm1181_vm4, %v1153_v34, %v4044_v16  ;;  %v1484_v2 = vrot.slane %v1382_v55, %v4285_v25  ;;  %v1315_v9 = vsel %vm1313_vm8, %v1282_v0, %v923_v48  ;;  %v1317_v12 = vsel %vm1313_vm8, %v1284_v33, %v927_v14  ;;  %v2997_v14 = vld [vmem:[%s3178_s27 + $0x70] sm:$0xff] }
 0x17c   : > { %775 = vrot.lane.b32.xlu1 %v5435_v35, %s3096_s4  ;;  %747 = vrot.lane.b32.xlu0 %v5436_v47, %s3096_s4  ;;  %v1219_v16 = vsel %vm1214_vm5, %v1186_v24, %v4224_v60  ;;  %v1491_v54 = vrot.slane %v1477_v58, %v4285_v25  ;;  %v1972_v42 = vcombine.low %v1451_v19, %v1459_v13  ;;  %v5437_v19 = vld [vmem:[#allocation12_spill] sm:$0xff] }
 0x17d   : > { %v1252_v36 = vsel %vm1247_vm6, %v1219_v16, %v4251_v62  ;;  %v1492_v37 = vcombine.high %v1484_v2, %v1484_v2  ;;  %v1973_v33 = vcombine.low %v1458_v59, %v1460_v31 }
 0x17e   : > { %v1026_v8 = vpop.permute.xlu1 %1025  ;;  %v1022_v28 = vpop.permute.xlu0 %1021  ;;  %v1285_v62 = vsel %vm1280_vm7, %v1252_v36, %v4275_v44  ;;  %v5438_v44 = vld [vmem:[#allocation10_spill] sm:$0xff] }
 0x17f   : > { %v1350_v21 = vsel %vm1346_vm9, %v1317_v12, %v1026_v8  ;;  %v1348_v57 = vsel %vm1346_vm9, %v1315_v9, %v1022_v28  ;;  %v1318_v9 = vsel %vm1313_vm8, %v1285_v62, %v929_v41  ;;  %v1493_v12 = vcombine.high %v1491_v54, %v1491_v54 }
 0x180   : > { %v1383_v55 = vsel %vm1379_vm10, %v1350_v21, 0.0  ;;  %v1381_v48 = vsel %vm1379_vm10, %v1348_v57, 0.0  ;;  %869 = vrot.lane.b32.xlu1 %v2996_v56, %s3097_s5  ;;  %841 = vrot.lane.b32.xlu0 %v2997_v14, %s3097_s5  ;;  %v1987_v56 = vrot.slane %v1973_v33, %v4285_v25  ;;  %v2006_v14 = vcombine.low %v1492_v37, %v1491_v54 }
 0x181   : > { %v1494_v60 = vcombine.high %v1383_v55, %v1383_v55  ;;  %v1501_v58 = vrot.slane %v1383_v55, %v4285_v25  ;;  %v1461_v5 = vcombine.high %v1381_v48, %v1381_v48  ;;  %v1468_v34 = vrot.slane %v1381_v48, %v4285_v25 }
 0x182   : > { %v4352_v24 = vpop.permute.xlu1 %660  ;;  %v1028_v0 = vpop.permute.xlu0 %1027 }
 0x183   : > { %v1508_v8 = vrot.slane %v1494_v60, %v4285_v25  ;;  %v1475_v28 = vrot.slane %v1461_v5, %v4285_v25  ;;  %v1509_v16 = vcombine.high %v1501_v58, %v1501_v58  ;;  %v1476_v21 = vcombine.high %v1468_v34, %v1468_v34 }
 0x184   : > { %v1351_v57 = vsel %vm1346_vm9, %v1318_v9, %v1028_v0  ;;  %650 = vrot.lane.b32.xlu1 %v5437_v19, %s3095_s3  ;;  %646 = vrot.lane.b32.xlu0 %v5438_v44, %s3095_s3  ;;  %v2007_v41 = vcombine.low %v1493_v12, %v1501_v58  ;;  %v1980_v60 = vrot.slane %v1972_v42, %v4285_v25 }
 0x185   : > { %v4363_v13 = vsel %vm1379_vm10, %v1351_v57, 0.0  ;;  %v1990_v59 = vcombine.low %v1475_v28, %v1484_v2  ;;  %v1989_v31 = vcombine.low %v1468_v34, %v1476_v21  ;;  %v2023_v62 = vcombine.low %v1509_v16, %v1508_v8  ;;  %v5439_v2 = vld [vmem:[#allocation24_spill] sm:$0xff] }
 0x186   : > { %v1517_v36 = vrot.slane %v4363_v13, %v4285_v25  ;;  %v4367_v55 = vpop.permute.xlu1 %640  ;;  %v4369_v48 = vpop.permute.xlu0 %636  ;;  %v2021_v34 = vrot.slane %v2007_v41, %v4285_v25  ;;  %v1988_v42 = vcombine.low %v1980_v60, %v1987_v56  ;;  %v2014_v12 = vrot.slane %v2006_v14, %v4285_v25  ;;  %v5440_v14 = vld [vmem:[#allocation39_spill] sm:$0xff] }
 0x187   : > { %v2004_v5 = vrot.slane %v1990_v59, %v4285_v25  ;;  %v1997_v58 = vrot.slane %v1989_v31, %v4285_v25  ;;  %v2031_v16 = vrot.slane %v2023_v62, %v4285_v25  ;;  %v2999_v31 = vld [vmem:[%s3178_s27 + $0xf0] sm:$0xff]  ;;  %v5442_v62 = vld [vmem:[#allocation41_spill] sm:$0xff] }
 0x188   : > { %v1525_v0 = vcombine.high %v1517_v36, %v1517_v36  ;;  %741 = vrot.lane.b32.xlu1 %v5420_v10, %s3096_s4  ;;  %674 = vrot.lane.b32.xlu0 %v5439_v2, %s3095_s3  ;;  %v2998_v10 = vld [vmem:[%s3178_s27 + $0x80] sm:$0xff]  ;;  %v2022_v59 = vcombine.low %v2014_v12, %v2021_v34  ;;  %v3000_v34 = vld [vmem:[%s3178_s27 + $0xd8] sm:$0xff]  ;;  %v5444_v12 = vld [vmem:[#allocation15_spill] sm:$0xff] }
 0x189   : > { %v2005_v37 = vcombine.low %v1997_v58, %v2004_v5 }
 0x18a   : > { %v2024_v9 = vcombine.low %v1517_v36, %v1525_v0  ;;  %v4380_v33 = vpop.permute.xlu1 %759  ;;  %v4382_v54 = vpop.permute.xlu0 %664 }
 0x18b   : > { %v2476_v28 = vpack.c.bf16 %v2005_v37, %v1988_v42  ;;  %v5443_v37 = vld [vmem:[#allocation33_spill] sm:$0xff] }
 0x18c   : > { %v2038_v8 = vrot.slane %v2024_v9, %v4285_v25  ;;  %845 = vrot.lane.b32.xlu1 %v2998_v10, %s3097_s5  ;;  %769 = vrot.lane.b32.xlu0 %v5422_v61, %s3096_s4  ;;  %v3001_v9 = vld [vmem:[%s3178_s27 + $0x68] sm:$0xff] }
 0x18d   : > { %2871 = vmatprep.mubr.bf16.mxu0 %v2476_v28 }
 0x18e   : > { %v4391_v21 = vpop.permute.xlu1 %662  ;;  %v4393_v57 = vpop.permute.xlu0 %634  ;;  %v2039_v41 = vcombine.low %v2031_v16, %v2038_v8 }
 0x190   : > { %940 = vrot.lane.b32.xlu1 %v5427_v45, %s3098_s16  ;;  %873 = vrot.lane.b32.xlu0 %v2999_v31, %s3097_s5  ;;  %v2477_v36 = vpack.c.bf16 %v2039_v41, %v2022_v59  ;;  %v5441_v45 = vld [vmem:[#allocation53_spill] sm:$0xff]  ;;  %v3002_v59 = vld [vmem:[%s3178_s27 + $0x78] sm:$0xff] }
 0x191   : > { %v5445_v41 = vld [vmem:[#allocation28_spill] sm:$0xff] }
 0x192   : > { %2872 = vmatmul.mubr.bf16.vlgmr.msra.gmra.mrb[0].mxu0 %v2477_v36  ;;  %v4399_v61 = vpop.permute.xlu1 %739  ;;  %v4401_v56 = vpop.permute.xlu0 %735 }
 0x194   : > { %745 = vrot.lane.b32.xlu1 %v5440_v14, %s3096_s4  ;;  %968 = vrot.lane.b32.xlu0 %v5426_v26, %s3098_s16 }
 0x196   : > { %v858_v60 = vpop.permute.xlu1 %857  ;;  %v4407_v5 = vpop.permute.xlu0 %763 }
 0x198   : > { %773 = vrot.lane.b32.xlu1 %v5441_v45, %s3096_s4  ;;  %749 = vrot.lane.b32.xlu0 %v5442_v62, %s3096_s4 }
 0x19a   : > { %v4413_v0 = vpop.permute.xlu1 %666  ;;  %v4415_v58 = vpop.permute.xlu0 %638 }
 0x19c   : > { %867 = vrot.lane.b32.xlu1 %v3000_v34, %s3097_s5  ;;  %839 = vrot.lane.b32.xlu0 %v3001_v9, %s3097_s5  ;;  %v3003_v34 = vld [vmem:[%s3178_s27 + $0xe8] sm:$0xff] }
 0x19e   : > { %v4421_v26 = vpop.permute.xlu1 %733  ;;  %v4423_v42 = vpop.permute.xlu0 %668 }
 0x1a0   : > { %972 = vrot.lane.b32.xlu1 %v5443_v37, %s3098_s16  ;;  %944 = vrot.lane.b32.xlu0 %v5444_v12, %s3098_s16 }
 0x1a2   : > { %v834_v8 = vpop.permute.xlu1 %833  ;;  %v4429_v10 = vpop.permute.xlu0 %761 }
 0x1a4   : > { %1067 = vrot.lane.b32.xlu1 %v5435_v35, %s3099_s25  ;;  %1039 = vrot.lane.b32.xlu0 %v5436_v47, %s3099_s25  ;;  %v3004_v35 = vld [vmem:[%s3178_s27 + $0x88] sm:$0xff] }
 0x1a6   : > { %v4435_v28 = vpop.permute.xlu1 %861  ;;  %v4437_v16 = vpop.permute.xlu0 %837 }
 0x1a8   : > { %843 = vrot.lane.b32.xlu1 %v3002_v59, %s3097_s5  ;;  %678 = vrot.lane.b32.xlu0 %v5445_v41, %s3095_s3 }
 0x1aa   : > { %v4443_v31 = vpop.permute.xlu1 %737  ;;  %v957_v36 = vpop.permute.xlu0 %956 }
 0x1ac   : > { %871 = vrot.lane.b32.xlu1 %v3003_v34, %s3097_s5  ;;  %847 = vrot.lane.b32.xlu0 %v3004_v35, %s3097_s5  ;;  %v5447_v34 = vld [vmem:[#allocation44_spill] sm:$0xff]  ;;  %v1510_v35 = vcombine.high %v4363_v13, %v4363_v13  ;;  %v1233_v13 = vsel %vm1214_vm5, %v4132_v53, %v4352_v24  ;;  %v4495_v53 = vrot.slane %v3779_v51, 2  ;;  %v621_v24 = vrot.slane %v3782_v17, 1 }
 0x1ae   : > { %v4449_v47 = vpop.permute.xlu1 %767  ;;  %v4451_v9 = vpop.permute.xlu0 %765 }
 0x1b0   : > { %966 = vrot.lane.b32.xlu1 %v5439_v2, %s3098_s16  ;;  %938 = vrot.lane.b32.xlu0 %v5438_v44, %s3098_s16  ;;  %v5448_v44 = vld [vmem:[#allocation55_spill] sm:$0xff]  ;;  %v1524_v2 = vrot.slane %v1510_v35, %v4285_v25 }
 0x1b2   : > { %v4457_v59 = vpop.permute.xlu1 %859  ;;  %v4459_v15 = vpop.permute.xlu0 %831  ;;  %v1526_v6 = vcombine.high %v1524_v2, %v1524_v2 }
 0x1b4   : > { %1071 = vrot.lane.b32.xlu1 %v5446_v23, %s3099_s25  ;;  %1043 = vrot.lane.b32.xlu0 %v5447_v34, %s3099_s25 }
 0x1b6   : > { %v937_v38 = vpop.permute.xlu1 %936  ;;  %v933_v29 = vpop.permute.xlu0 %932 }
 0x1b8   : > { %942 = vrot.lane.b32.xlu1 %v5437_v19, %s3098_s16  ;;  %777 = vrot.lane.b32.xlu0 %v5448_v44, %s3096_s4  ;;  %v1266_v19 = vsel %vm1247_vm6, %v1233_v13, %v4380_v33  ;;  %v720_v33 = vrot.slane %v3782_v17, 2  ;;  %v4500_v13 = vcombine.low %v1524_v2, %v1526_v6  ;;  %v3005_v17 = vld [vmem:[%s3178_s27 + $0xf8] sm:$0xff] }
 0x1b9   : > { %v1299_v35 = vsel %vm1280_vm7, %v1266_v19, %v858_v60 }
 0x1ba   : > { %v1056_v43 = vpop.permute.xlu1 %1055  ;;  %v961_v63 = vpop.permute.xlu0 %960  ;;  %v1332_v4 = vsel %vm1313_vm8, %v1299_v35, %v957_v36  ;;  %v2048_v2 = vrot.slane %v4500_v13, %v4285_v25  ;;  %v1234_v35 = vsel %vm1214_vm5, %v4128_v52, %v4391_v21  ;;  %v5450_v52 = vld [vmem:[#allocation43_spill] sm:$0xff]  ;;  %v1236_v21 = vsel %vm1214_vm5, %v4140_v30, %v4413_v0 }
 0x1bb   : > { %v1365_v60 = vsel %vm1346_vm9, %v1332_v4, %v1056_v43  ;;  %v1223_v43 = vsel %vm1214_vm5, %v4072_v46, %v4367_v55 }
 0x1bc   : > { %970 = vrot.lane.b32.xlu1 %v5445_v41, %s3098_s16  ;;  %946 = vrot.lane.b32.xlu0 %v5449_v39, %s3098_s16  ;;  %v4487_v41 = vrot.slane %v3779_v51, 1 }
 0x1be   : > { %v4481_v49 = vpop.permute.xlu1 %863  ;;  %v4483_v27 = vpop.permute.xlu0 %835  ;;  %v4519_v4 = vsel %vm233_vm0, %v621_v24, %v4487_v41 }
 0x1c0   : > { %1065 = vrot.lane.b32.xlu1 %v5441_v45, %s3099_s25  ;;  %1037 = vrot.lane.b32.xlu0 %v5440_v14, %s3099_s25  ;;  %v1221_v45 = vsel %vm1214_vm5, %v4060_v11, %v4369_v48  ;;  %v1398_v14 = vsel %vm1379_vm10, %v1365_v60, 0.0  ;;  %v4523_v11 = vsel %vm378_vm1, %v720_v33, %v4495_v53  ;;  %v1235_v48 = vsel %vm1214_vm5, %v4144_v3, %v4382_v54 }
 0x1c1   : > { %v1254_v51 = vsel %vm1247_vm6, %v1221_v45, %v4401_v56  ;;  %v1741_v24 = vcombine.high %v1398_v14, %v1398_v14  ;;  %v4540_v33 = vrot.slane %v1398_v14, %v4285_v25  ;;  %v1256_v3 = vsel %vm1247_vm6, %v1223_v43, %v4399_v61 }
 0x1c2   : > { %v4502_v19 = vpop.permute.xlu1 %930  ;;  %v4504_v36 = vpop.permute.xlu0 %865  ;;  %v1287_v6 = vsel %vm1280_vm7, %v1254_v51, %v834_v8  ;;  %v1268_v55 = vsel %vm1247_vm6, %v1235_v48, %v4407_v5  ;;  %v1289_v61 = vsel %vm1280_vm7, %v1256_v3, %v4437_v16  ;;  %v5451_v3 = vld [vmem:[#allocation17_spill] sm:$0xff] }
 0x1c3   : > { %v1320_v56 = vsel %vm1313_vm8, %v1287_v6, %v933_v29  ;;  %v1220_v29 = vsel %vm1214_vm5, %v4048_v22, %v4393_v57  ;;  %v1222_v22 = vsel %vm1214_vm5, %v4056_v50, %v4415_v58  ;;  %v1301_v57 = vsel %vm1280_vm7, %v1268_v55, %v4435_v28  ;;  %v5452_v55 = vld [vmem:[#allocation32_spill] sm:$0xff] }
 0x1c4   : > { %1041 = vrot.lane.b32.xlu1 %v5442_v62, %s3099_s25  ;;  %875 = vrot.lane.b32.xlu0 %v3005_v17, %s3097_s5  ;;  %v1322_v5 = vsel %vm1313_vm8, %v1289_v61, %v937_v38  ;;  %v4571_v0 = vrot.slane %v1741_v24, %v4285_v25  ;;  %v1756_v50 = vcombine.high %v4540_v33, %v4540_v33 }
 0x1c5   : > { %v1253_v38 = vsel %vm1247_vm6, %v1220_v29, %v4421_v26  ;;  %v1267_v17 = vsel %vm1247_vm6, %v1234_v35, %v4429_v10  ;;  %v1255_v26 = vsel %vm1247_vm6, %v1222_v22, %v4443_v31  ;;  %v1269_v24 = vsel %vm1247_vm6, %v1236_v21, %v4451_v9 }
 0x1c6   : > { %v1032_v62 = vpop.permute.xlu1 %1031  ;;  %v4532_v8 = vpop.permute.xlu0 %958  ;;  %v4604_v35 = vcombine.low %v1756_v50, %v4571_v0  ;;  %v1288_v22 = vsel %vm1280_vm7, %v1255_v26, %v4483_v27 }
 0x1c7   : > { %v1353_v46 = vsel %vm1346_vm9, %v1320_v56, %v1032_v62 }
 0x1c8   : > { %v1386_v54 = vsel %vm1379_vm10, %v1353_v46, 0.0  ;;  %1069 = vrot.lane.b32.xlu1 %v5448_v44, %s3099_s25  ;;  %1045 = vrot.lane.b32.xlu0 %v5450_v52, %s3099_s25  ;;  %v1334_v44 = vsel %vm1313_vm8, %v1301_v57, %v961_v63  ;;  %v1237_v63 = vsel %vm1214_vm5, %v4156_v1, %v4423_v42  ;;  %v1286_v46 = vsel %vm1280_vm7, %v1253_v38, %v4459_v15 }
 0x1c9   : > { %v1543_v60 = vcombine.high %v1386_v54, %v1386_v54  ;;  %v4568_v45 = vrot.slane %v1386_v54, %v4285_v25  ;;  %v1270_v10 = vsel %vm1247_vm6, %v1237_v63, %v4449_v47  ;;  %v1300_v47 = vsel %vm1280_vm7, %v1267_v17, %v4457_v59 }
 0x1ca   : > { %v1060_v51 = vpop.permute.xlu1 %1059  ;;  %v1036_v30 = vpop.permute.xlu0 %1035  ;;  %v1302_v54 = vsel %vm1280_vm7, %v1269_v24, %v4481_v49  ;;  %v1319_v9 = vsel %vm1313_vm8, %v1286_v46, %v4502_v19  ;;  %v1303_v59 = vsel %vm1280_vm7, %v1270_v10, %v4504_v36  ;;  %v1757_v49 = vcombine.high %v4571_v0, %v4571_v0 }
 0x1cb   : > { %v1367_v58 = vsel %vm1346_vm9, %v1334_v44, %v1060_v51  ;;  %v1355_v28 = vsel %vm1346_vm9, %v1322_v5, %v1036_v30  ;;  %v4593_v1 = vrot.slane %v1543_v60, %v4285_v25  ;;  %v1558_v42 = vcombine.high %v4568_v45, %v4568_v45 }
 0x1cc   : > { %v1400_v16 = vsel %vm1379_vm10, %v1367_v58, 0.0  ;;  %v1388_v14 = vsel %vm1379_vm10, %v1355_v28, 0.0  ;;  %680 = vrot.lane.b32.xlu1 %v5443_v37, %s3095_s3  ;;  %652 = vrot.lane.b32.xlu0 %v5444_v12, %s3095_s3  ;;  %v2252_v27 = vrot.slane %v4604_v35, %v4285_v25  ;;  %v1333_v19 = vsel %vm1313_vm8, %v1300_v47, %v4532_v8 }
 0x1cd   : > { %v1774_v6 = vcombine.high %v1400_v16, %v1400_v16  ;;  %v1576_v43 = vcombine.high %v1388_v14, %v1388_v14  ;;  %v1781_v48 = vrot.slane %v1400_v16, %v4285_v25  ;;  %v1583_v37 = vrot.slane %v1388_v14, %v4285_v25 }
 0x1ce   : > { %v963_v56 = vpop.permute.xlu1 %962  ;;  %v935_v12 = vpop.permute.xlu0 %934  ;;  %v4623_v15 = vcombine.low %v1558_v42, %v4593_v1  ;;  %v1559_v36 = vcombine.high %v4593_v1, %v4593_v1 }
 0x1cf   : > { %v1788_v62 = vrot.slane %v1774_v6, %v4285_v25  ;;  %v1590_v31 = vrot.slane %v1576_v43, %v4285_v25  ;;  %v1591_v29 = vcombine.high %v1583_v37, %v1583_v37  ;;  %v1789_v21 = vcombine.high %v1781_v48, %v1781_v48 }
 0x1d0   : > { %656 = vrot.lane.b32.xlu1 %v5451_v3, %s3095_s3  ;;  %974 = vrot.lane.b32.xlu0 %v5452_v55, %s3098_s16  ;;  %v1335_v0 = vsel %vm1313_vm8, %v1302_v54, %v963_v56  ;;  %v1321_v50 = vsel %vm1313_vm8, %v1288_v22, %v935_v12  ;;  %v2072_v14 = vrot.slane %v4623_v15, %v4285_v25  ;;  %v5453_v56 = vld [vmem:[#allocation59_spill] sm:$0xff] }
 0x1d1   : > { %v1790_v57 = vcombine.high %v1788_v62, %v1788_v62  ;;  %v1592_v61 = vcombine.high %v1590_v31, %v1590_v31  ;;  %v4634_v51 = vcombine.low %v1583_v37, %v1591_v29  ;;  %v4646_v28 = vcombine.low %v1781_v48, %v1789_v21 }
 0x1d2   : > { %v1030_v5 = vpop.permute.xlu1 %1029  ;;  %v965_v44 = vpop.permute.xlu0 %964 }
 0x1d3   : > { %v1352_v60 = vsel %vm1346_vm9, %v1319_v9, %v1030_v5  ;;  %v4648_v38 = vcombine.low %v1788_v62, %v1790_v57  ;;  %v4650_v63 = vcombine.low %v1590_v31, %v1592_v61  ;;  %v2099_v1 = vrot.slane %v4634_v51, %v4285_v25 }
 0x1d4   : > { %v1385_v30 = vsel %vm1379_vm10, %v1352_v60, 0.0  ;;  %751 = vrot.lane.b32.xlu1 %v5447_v34, %s3096_s4  ;;  %684 = vrot.lane.b32.xlu0 %v4519_v4, %s3095_s3  ;;  %v1336_v42 = vsel %vm1313_vm8, %v1303_v59, %v965_v44  ;;  %v2276_v22 = vrot.slane %v4646_v28, %v4285_v25 }
 0x1d5   : > { %v1527_v58 = vcombine.high %v1385_v30, %v1385_v30  ;;  %v1534_v8 = vrot.slane %v1385_v30, %v4285_v25  ;;  %v2106_v54 = vrot.slane %v4650_v63, %v4285_v25 }
 0x1d6   : > { %v1034_v34 = vpop.permute.xlu1 %1033  ;;  %v1058_v16 = vpop.permute.xlu0 %1057 }
 0x1d7   : > { %v1541_v17 = vrot.slane %v1527_v58, %v4285_v25  ;;  %v1542_v26 = vcombine.high %v1534_v8, %v1534_v8  ;;  %v1354_v6 = vsel %vm1346_vm9, %v1321_v50, %v1034_v34  ;;  %v1366_v43 = vsel %vm1346_vm9, %v1333_v19, %v1058_v16 }
 0x1d8   : > { %v1387_v48 = vsel %vm1379_vm10, %v1354_v6, 0.0  ;;  %v1399_v37 = vsel %vm1379_vm10, %v1366_v43, 0.0  ;;  %1073 = vrot.lane.b32.xlu1 %v5453_v56, %s3099_s25  ;;  %779 = vrot.lane.b32.xlu0 %v5446_v23, %s3096_s4 }
 0x1d9   : > { %v2041_v12 = vcombine.low %v1534_v8, %v1542_v26  ;;  %v2057_v10 = vcombine.low %v1541_v17, %v4568_v45  ;;  %v1560_v62 = vcombine.high %v1387_v48, %v1387_v48  ;;  %v1567_v31 = vrot.slane %v1387_v48, %v4285_v25 }
 0x1da   : > { %v1758_v24 = vcombine.high %v1399_v37, %v1399_v37  ;;  %v1765_v46 = vrot.slane %v1399_v37, %v4285_v25  ;;  %v1064_v29 = vpop.permute.xlu1 %1063  ;;  %v1062_v47 = vpop.permute.xlu0 %1061  ;;  %v2107_v37 = vcombine.low %v2099_v1, %v2106_v54  ;;  %v3007_v54 = vld [vmem:[%s3178_s27 + $0x90] sm:$0xff] }
 0x1db   : > { %v2055_v9 = vrot.slane %v2041_v12, %v4285_v25  ;;  %v1574_v23 = vrot.slane %v1560_v62, %v4285_v25  ;;  %v1575_v15 = vcombine.high %v1567_v31, %v1567_v31  ;;  %v2074_v45 = vcombine.low %v1559_v36, %v1567_v31 }
 0x1dc   : > { %v1772_v21 = vrot.slane %v1758_v24, %v4285_v25  ;;  %v1773_v57 = vcombine.high %v1765_v46, %v1765_v46  ;;  %v2245_v61 = vcombine.low %v1757_v49, %v1765_v46  ;;  %v1369_v5 = vsel %vm1346_vm9, %v1336_v42, %v1064_v29  ;;  %682 = vrot.lane.b32.xlu1 %v5452_v55, %s3095_s3  ;;  %v3006_v46 = vld [vmem:[%s3178_s27 + $0x100] sm:$0xff] }
 0x1dd   : > { %v2075_v44 = vcombine.low %v1575_v15, %v1574_v23  ;;  %v2082_v59 = vrot.slane %v2074_v45, %v4285_v25  ;;  %v1402_v60 = vsel %vm1379_vm10, %v1369_v5, 0.0  ;;  %v1368_v19 = vsel %vm1346_vm9, %v1335_v0, %v1062_v47  ;;  %654 = vrot.lane.b32.xlu0 %v5449_v39, %s3095_s3 }
 0x1de   : > { %v1807_v51 = vcombine.high %v1402_v60, %v1402_v60  ;;  %v1814_v30 = vrot.slane %v1402_v60, %v4285_v25  ;;  %v1401_v49 = vsel %vm1379_vm10, %v1368_v19, 0.0  ;;  %v673_v36 = vpop.permute.xlu1 %672  ;;  %v645_v50 = vpop.permute.xlu0 %644  ;;  %v2056_v55 = vcombine.low %v2048_v2, %v2055_v9  ;;  %v5456_v60 = vld [vmem:[#allocation64_spill] sm:$0xff] }
 0x1df   : > { %v1791_v58 = vcombine.high %v1401_v49, %v1401_v49  ;;  %v1798_v8 = vrot.slane %v1401_v49, %v4285_v25  ;;  %v1239_v0 = vsel %vm1214_vm5, %v4168_v7, %v673_v36  ;;  %v1225_v39 = vsel %vm1214_vm5, %v4084_v18, %v645_v50  ;;  %v5454_v7 = vld [vmem:[#allocation46_spill] sm:$0xff] }
 0x1e0   : > { %v4695_v28 = vrot.slane %v1807_v51, %v4285_v25  ;;  %v1822_v63 = vcombine.high %v1814_v30, %v1814_v30  ;;  %783 = vrot.lane.b32.xlu1 %v4523_v11, %s3096_s4  ;;  %v2065_v34 = vrot.slane %v2057_v10, %v4285_v25  ;;  %v2089_v13 = vrot.slane %v2075_v44, %v4285_v25  ;;  %v199_v51 = vld [vmem:[%s3178_s27 + $0x110] sm:$0xff] }
 0x1e1   : > { %v1805_v2 = vrot.slane %v1791_v58, %v4285_v25  ;;  %v1806_v16 = vcombine.high %v1798_v8, %v1798_v8  ;;  %755 = vrot.lane.b32.xlu0 %v5454_v7, %s3096_s4  ;;  %v2259_v18 = vrot.slane %v2245_v61, %v4285_v25  ;;  %v2261_v17 = vcombine.low %v1773_v57, %v1772_v21 }
 0x1e2   : > { %v2296_v26 = vcombine.low %v1822_v63, %v4695_v28  ;;  %v2073_v6 = vcombine.low %v2065_v34, %v2072_v14  ;;  %v677_v43 = vpop.permute.xlu1 %676  ;;  %v649_v42 = vpop.permute.xlu0 %648  ;;  %v2090_v48 = vcombine.low %v2082_v59, %v2089_v13  ;;  %v917_v63 = vrot.slane %v199_v51, 1  ;;  %v5458_v34 = vld [vmem:[#allocation45_spill] sm:$0xff] }
 0x1e3   : > { %v2279_v12 = vcombine.low %v1798_v8, %v1806_v16  ;;  %v2295_v10 = vcombine.low %v1805_v2, %v1814_v30  ;;  %v1241_v62 = vsel %vm1214_vm5, %v4180_v20, %v677_v43  ;;  %v1227_v31 = vsel %vm1214_vm5, %v4096_v32, %v649_v42  ;;  %v200_v8 = vld [vmem:[%s3178_s27 + $0x118] sm:$0xff]  ;;  %v5460_v42 = vld [vmem:[#allocation19_spill] sm:$0xff] }
 0x1e4   : > { %v2478_v24 = vpack.c.bf16 %v2073_v6, %v2056_v55  ;;  %877 = vrot.lane.b32.xlu1 %v3006_v46, %s3097_s5  ;;  %v2479_v29 = vpack.c.bf16 %v2107_v37, %v2090_v48  ;;  %v2260_v14 = vcombine.low %v2252_v27, %v2259_v18  ;;  %v2269_v47 = vrot.slane %v2261_v17, %v4285_v25  ;;  %v3009_v18 = vld [vmem:[%s3178_s27 + $0x108] sm:$0xff]  ;;  %v3010_v17 = vld [vmem:[%s3178_s27 + $0x98] sm:$0xff] }
 0x1e5   : > { %v2293_v1 = vrot.slane %v2279_v12, %v4285_v25  ;;  %849 = vrot.lane.b32.xlu0 %v3007_v54, %s3097_s5  ;;  %v2286_v20 = vrot.slane %v4648_v38, %v4285_v25  ;;  %v2303_v32 = vrot.slane %v2295_v10, %v4285_v25  ;;  %v2310_v9 = vrot.slane %v2296_v26, %v4285_v25  ;;  %v5455_v38 = vld [vmem:[#allocation16_spill] sm:$0xff] }
 0x1e6   : > { %2875 = vmatprep.mubr.bf16.mxu0 %v2478_v24  ;;  %v2277_v23 = vcombine.low %v2269_v47, %v2276_v22  ;;  %v772_v15 = vpop.permute.xlu1 %771  ;;  %v744_v45 = vpop.permute.xlu0 %743  ;;  %v918_v13 = vrot.slane %v200_v8, 1  ;;  %v3011_v24 = vld [vmem:[%s3178_s27 + $0xa8] sm:$0xff]  ;;  %v1017_v46 = vrot.slane %v200_v8, 2 }
 0x1e7   : > { %2876 = vmatmul.mubr.bf16.gmra.mrb[4].mxu0 %v2479_v29  ;;  %v4724_v35 = vsel %vm1247_vm6, %v1239_v0, %v772_v15  ;;  %v4727_v27 = vsel %vm1247_vm6, %v1225_v39, %v744_v45  ;;  %v2294_v21 = vcombine.low %v2286_v20, %v2293_v1  ;;  %v2311_v57 = vcombine.low %v2303_v32, %v2310_v9  ;;  %v5457_v0 = vld [vmem:[#allocation7_spill] sm:$0xff]  ;;  %v5461_v1 = vld [vmem:[#allocation48_spill] sm:$0xff]  ;;  %v5462_v32 = vld [vmem:[#allocation18_spill] sm:$0xff] }
 0x1e8   : > { %v2484_v61 = vpack.c.bf16 %v2277_v23, %v2260_v14  ;;  %686 = vrot.lane.b32.xlu1 %v4487_v41, %s3095_s3  ;;  %v919_v26 = vsel %vm233_vm0, %v917_v63, %v918_v13 }
 0x1e9   : > { %658 = vrot.lane.b32.xlu0 %v5455_v38, %s3095_s3  ;;  %v2485_v22 = vpack.c.bf16 %v2311_v57, %v2294_v21 }
 0x1ea   : > { %2887 = vmatprep.mubr.bf16.mxu1 %v2484_v61  ;;  %v671_v5 = vpop.permute.xlu1 %670  ;;  %v643_v44 = vpop.permute.xlu0 %642  ;;  %v5463_v61 = vld [vmem:[#allocation47_spill] sm:$0xff] }
 0x1eb   : > { %2888 = vmatmul.mubr.bf16.vlgmr.msra.gmra.mrb[0].mxu1 %v2485_v22  ;;  %v4735_v59 = vsel %vm1214_vm5, %v4152_v40, %v671_v5  ;;  %v4739_v19 = vsel %vm1214_vm5, %v5456_v60, %v643_v44  ;;  %v3008_v40 = vld [vmem:[%s3178_s27 + $0xa0] sm:$0xff]  ;;  %s153_s27 = sand.u32 1, %s3074_s10  }
 0x1ec   : > { %781 = vrot.lane.b32.xlu1 %v5453_v56, %s3096_s4  ;;  %s2915_s3 = smul.u32 224, %s153_s27 }
 0x1ed   : > { %753 = vrot.lane.b32.xlu0 %v5450_v52, %s3096_s4 }
 0x1ee   : > { %v776_v30 = vpop.permute.xlu1 %775  ;;  %v748_v49 = vpop.permute.xlu0 %747 }
 0x1ef   : > { %v1274_v36 = vsel %vm1247_vm6, %v1241_v62, %v776_v30  ;;  %v4748_v50 = vsel %vm1247_vm6, %v1227_v31, %v748_v49  ;;  %v1016_v31 = vrot.slane %v199_v51, 2 }
 0x1f0   : > { %881 = vrot.lane.b32.xlu1 %v199_v51, %s3097_s5 }
 0x1f1   : > { %853 = vrot.lane.b32.xlu0 %v3008_v40, %s3097_s5 }
 0x1f2   : > { %v870_v55 = vpop.permute.xlu1 %869  ;;  %v4753_v56 = vpop.permute.xlu0 %841 }
 0x1f3   : > { %v1305_v23 = vsel %vm1280_vm7, %v4724_v35, %v870_v55  ;;  %v1291_v35 = vsel %vm1280_vm7, %v4727_v27, %v4753_v56 }
 0x1f4   : > { %976 = vrot.lane.b32.xlu1 %v4519_v4, %s3098_s16 }
 0x1f5   : > { %948 = vrot.lane.b32.xlu0 %v5451_v3, %s3098_s16  ;;  %v5459_v3 = vld [vmem:[#allocation26_spill] sm:$0xff] }
 0x1f6   : > { %v651_v52 = vpop.permute.xlu1 %650  ;;  %v4759_v58 = vpop.permute.xlu0 %646 }
 0x1f7   : > { %v4764_v39 = vsel %vm1214_vm5, %v5457_v0, %v651_v52 }
 0x1f8   : > { %785 = vrot.lane.b32.xlu1 %v4495_v53, %s3096_s4 }
 0x1f9   : > { %757 = vrot.lane.b32.xlu0 %v5458_v34, %s3096_s4  ;;  %s4981_s4 = scalar_lea.vmem [#allocation2], %s2915_s3 }
 0x1fa   : > { %v4770_v4 = vpop.permute.xlu1 %741  ;;  %v675_v2 = vpop.permute.xlu0 %674 }
 0x1fb   : > { %v4774_v16 = vsel %vm1214_vm5, %v5459_v3, %v675_v2 }
 0x1fc   : > { %879 = vrot.lane.b32.xlu1 %v3009_v18, %s3097_s5 }
 0x1fd   : > { %851 = vrot.lane.b32.xlu0 %v3010_v17, %s3097_s5 }
 0x1fe   : > { %v846_v6 = vpop.permute.xlu1 %845  ;;  %v4781_v43 = vpop.permute.xlu0 %769 }
 0x200   : > { %980 = vrot.lane.b32.xlu1 %v919_v26, %s3098_s16 }
 0x201   : > { %952 = vrot.lane.b32.xlu0 %v5460_v42, %s3098_s16  ;;  %v5464_v42 = vld [vmem:[#allocation65_spill] sm:$0xff] }
 0x202   : > { %v941_v48 = vpop.permute.xlu1 %940  ;;  %v874_v37 = vpop.permute.xlu0 %873 }
 0x203   : > { %v4787_v12 = vsel %vm1280_vm7, %v1274_v36, %v874_v37  ;;  %v1324_v5 = vsel %vm1313_vm8, %v1291_v35, %v941_v48  ;;  %v1226_v48 = vsel %vm1214_vm5, %v5464_v42, %v4759_v58  ;;  %v1257_v37 = vsel %vm1247_vm6, %v4739_v19, %v4770_v4 }
 0x204   : > { %1075 = vrot.lane.b32.xlu1 %v4523_v11, %s3099_s25  ;;  %v1018_v11 = vsel %vm378_vm1, %v1016_v31, %v1017_v46 }
 0x205   : > { %1047 = vrot.lane.b32.xlu0 %v5454_v7, %s3099_s25 }
 0x206   : > { %v4793_v10 = vpop.permute.xlu1 %745  ;;  %v969_v62 = vpop.permute.xlu0 %968 }
 0x207   : > { %v1338_v21 = vsel %vm1313_vm8, %v1305_v23, %v969_v62  ;;  %v1271_v62 = vsel %vm1247_vm6, %v4735_v59, %v4781_v43 }
 0x208   : > { %883 = vrot.lane.b32.xlu1 %v200_v8, %s3097_s5  ;;  %v1293_v8 = vsel %vm1280_vm7, %v4748_v50, %v846_v6  ;;  %v1823_v6 = vcombine.high %v4695_v28, %v4695_v28 }
 0x209   : > { %855 = vrot.lane.b32.xlu0 %v3011_v24, %s3097_s5  ;;  %s2917_s5 = smul.u32 3584, %s3082_s12  ;;  %s5148_s12 = scalar_lea.sflag [#allocation3], %s153_s27 }
 0x20a   : > { %v774_v29 = vpop.permute.xlu1 %773  ;;  %v750_v14 = vpop.permute.xlu0 %749 }
 0x20b   : > { %v1273_v28 = vsel %vm1247_vm6, %v4774_v16, %v774_v29  ;;  %v1261_v58 = vsel %vm1247_vm6, %v4764_v39, %v750_v14  ;;  %s5140_s24 = scalar_lea.hbm %s5197_s2, %s2917_s5 }
 0x20c   : > { %978 = vrot.lane.b32.xlu1 %v4487_v41, %s3098_s16 }
 0x20d   : > { %950 = vrot.lane.b32.xlu0 %v5455_v38, %s3098_s16 }
 0x20e   : > { %v868_v7 = vpop.permute.xlu1 %867  ;;  %v840_v47 = vpop.permute.xlu0 %839 }
 0x20f   : > { %v1290_v19 = vsel %vm1280_vm7, %v1257_v37, %v840_v47 }
 0x210   : > { %1079 = vrot.lane.b32.xlu1 %v1018_v11, %s3099_s25  ;;  %v1259_v11 = vsel %vm1247_vm6, %v1226_v48, %v4793_v10 }
 0x211   : > { %1051 = vrot.lane.b32.xlu0 %v5461_v1, %s3099_s25  ;;  %v1304_v1 = vsel %vm1280_vm7, %v1271_v62, %v868_v7 }
 0x212   : > { %v973_v54 = vpop.permute.xlu1 %972  ;;  %v945_v20 = vpop.permute.xlu0 %944 }
 0x213   : > { %v1326_v56 = vsel %vm1313_vm8, %v1293_v8, %v945_v20  ;;  %v1340_v4 = vsel %vm1313_vm8, %v4787_v12, %v973_v54 }
 0x214   : > { %982 = vrot.lane.b32.xlu1 %v918_v13, %s3098_s16 }
 0x215   : > { %954 = vrot.lane.b32.xlu0 %v5462_v32, %s3098_s16  ;;  %s2743_s16 = sshll.u32 %s4981_s4, 4  ;;  %s5142_s16 = int_to_ptr.vmem [resolvable:$true] %s2743_s16 }
 0x216   : > { %v1068_v41 = vpop.permute.xlu1 %1067  ;;  %v1040_v9 = vpop.permute.xlu0 %1039  ;;  %p3019_p1 = scmp.lt.s32.totalorder %s5142_s16, %s3017_s28 }
 0x217   : > { %v1371_v57 = vsel %vm1346_vm9, %v1338_v21, %v1068_v41  ;;  %v1357_v60 = vsel %vm1346_vm9, %v1324_v5, %v1040_v9 }
 0x218   : > { %1077 = vrot.lane.b32.xlu1 %v4495_v53, %s3099_s25  ;;  %v1404_v22 = vsel %vm1379_vm10, %v1371_v57, 0.0  ;;  %v1390_v36 = vsel %vm1379_vm10, %v1357_v60, 0.0 }
 0x219   : > { %1049 = vrot.lane.b32.xlu0 %v5458_v34, %s3099_s25  ;;  %v1840_v44 = vcombine.high %v1404_v22, %v1404_v22  ;;  %v1847_v49 = vrot.slane %v1404_v22, %v4285_v25  ;;  %v1609_v0 = vcombine.high %v1390_v36, %v1390_v36  ;;  %v4834_v27 = vrot.slane %v1390_v36, %v4285_v25 }
 0x21a   : > { %v844_v15 = vpop.permute.xlu1 %843  ;;  %v4815_v45 = vpop.permute.xlu0 %678 }
 0x21b   : > { %v1854_v40 = vrot.slane %v1840_v44, %v4285_v25  ;;  %v1855_v63 = vcombine.high %v1847_v49, %v1847_v49  ;;  %v4841_v18 = vrot.slane %v1609_v0, %v4285_v25  ;;  %v1624_v17 = vcombine.high %v4834_v27, %v4834_v27 }
 0x21c   : > { %1081 = vrot.lane.b32.xlu1 %v1017_v46, %s3099_s25  ;;  %v1292_v10 = vsel %vm1280_vm7, %v1259_v11, %v844_v15 }
 0x21d   : > { %1053 = vrot.lane.b32.xlu0 %v5463_v61, %s3099_s25  ;;  %v1856_v34 = vcombine.high %v1854_v40, %v1854_v40  ;;  %v2329_v50 = vcombine.low %v1847_v49, %v1855_v63  ;;  %v4868_v59 = vcombine.low %v1624_v17, %v4841_v18  ;;  %v1625_v39 = vcombine.high %v4841_v18, %v4841_v18  ;;  %s3012_s25 = scalar_lea.vmem %s5142_s16, 3584 }
 0x21e   : > { %v872_v38 = vpop.permute.xlu1 %871  ;;  %v848_v53 = vpop.permute.xlu0 %847  ;;  %p3013_p12 = scmp.ne.s32.totalorder %s5142_s16, %s3012_s25  ;;  %p3020_p2 = scmp.lt.s32.totalorder %s3018_s30, %s3012_s25 }
 0x21f   : > { %v2330_v31 = vcombine.low %v1854_v40, %v1856_v34  ;;  %v2337_v20 = vrot.slane %v2329_v50, %v4285_v25  ;;  %v1306_v16 = vsel %vm1280_vm7, %v1273_v28, %v872_v38  ;;  %v1294_v32 = vsel %vm1280_vm7, %v1261_v58, %v848_v53 }
 0x220   : > { %v2133_v61 = vrot.slane %v4868_v59, %v4285_v25  ;;  %p3014_p13 = pnand %p3013_p12, %p3158_p4  ;;  %p3021_p3 = por %p3020_p2, %p3019_p1 }
 0x221   : > { %v2344_v54 = vrot.slane %v2330_v31, %v4285_v25 }
 0x222   : > { %v967_v51 = vpop.permute.xlu1 %966  ;;  %v939_v30 = vpop.permute.xlu0 %938  ;;  %p3015_p0 = pneg %p3014_p13 }
 0x223   : > { %v1337_v29 = vsel %vm1313_vm8, %v1304_v1, %v967_v51  ;;  %v1323_v14 = vsel %vm1313_vm8, %v1290_v19, %v939_v30  ;;  %v2345_v49 = vcombine.low %v2337_v20, %v2344_v54 }
 0x224   : > { %p3022_p5 = pnand %p3021_p3, %p3015_p0 }
 0x226   : > { %v1072_v55 = vpop.permute.xlu1 %1071  ;;  %v1044_v52 = vpop.permute.xlu0 %1043 }
 0x227   : > { %v1359_v13 = vsel %vm1346_vm9, %v1326_v56, %v1044_v52  ;;  %v1373_v41 = vsel %vm1346_vm9, %v1340_v4, %v1072_v55 }
 0x228   : > { %v1392_v26 = vsel %vm1379_vm10, %v1359_v13, 0.0  ;;  %v4891_v5 = vsel %vm1379_vm10, %v1373_v41, 0.0 }
 0x229   : > { %v1642_v43 = vcombine.high %v1392_v26, %v1392_v26  ;;  %v1649_v7 = vrot.slane %v1392_v26, %v4285_v25 }
 0x22a   : > { %v943_v2 = vpop.permute.xlu1 %942  ;;  %v4838_v3 = vpop.permute.xlu0 %777 }
 0x22b   : > { %v1656_v15 = vrot.slane %v1642_v43, %v4285_v25  ;;  %v1657_v44 = vcombine.high %v1649_v7, %v1649_v7  ;;  %v1325_v60 = vsel %vm1313_vm8, %v1292_v10, %v943_v2 }
 0x22d   : > { %v1658_v8 = vcombine.high %v1656_v15, %v1656_v15  ;;  %v2143_v58 = vcombine.low %v1649_v7, %v1657_v44  ;;  %v5465_v7 = vld [vmem:[#allocation29_spill] sm:$0xff] }
 0x22e   : > { %v971_v24 = vpop.permute.xlu1 %970  ;;  %v947_v46 = vpop.permute.xlu0 %946 }
 0x22f   : > { %v1339_v0 = vsel %vm1313_vm8, %v1306_v16, %v971_v24  ;;  %v1327_v34 = vsel %vm1313_vm8, %v1294_v32, %v947_v46 }
 0x232   : > { %v1066_v12 = vpop.permute.xlu1 %1065  ;;  %v1038_v47 = vpop.permute.xlu0 %1037 }
 0x233   : > { %v1370_v9 = vsel %vm1346_vm9, %v1337_v29, %v1066_v12  ;;  %v1356_v23 = vsel %vm1346_vm9, %v1323_v14, %v1038_v47  ;;  %v1880_v14 = vrot.slane %v4891_v5, %v4285_v25  ;;  %v5466_v47 = vld [vmem:[#allocation66_spill] sm:$0xff] }
 0x234   : > { %v1403_v21 = vsel %vm1379_vm10, %v1370_v9, 0.0  ;;  %v1389_v57 = vsel %vm1379_vm10, %v1356_v23, 0.0 }
 0x235   : > { %v1824_v38 = vcombine.high %v1403_v21, %v1403_v21  ;;  %v1831_v22 = vrot.slane %v1403_v21, %v4285_v25  ;;  %v1593_v35 = vcombine.high %v1389_v57, %v1389_v57  ;;  %v1600_v53 = vrot.slane %v1389_v57, %v4285_v25 }
 0x236   : > { %v1042_v51 = vpop.permute.xlu1 %1041  ;;  %v4894_v30 = vpop.permute.xlu0 %875  ;;  %v2159_v21 = vcombine.low %v1656_v15, %v1658_v8  ;;  %v1873_v8 = vcombine.high %v4891_v5, %v4891_v5 }
 0x237   : > { %v1838_v36 = vrot.slane %v1824_v38, %v4285_v25  ;;  %v1839_v40 = vcombine.high %v1831_v22, %v1831_v22  ;;  %v2312_v55 = vcombine.low %v1823_v6, %v1831_v22  ;;  %v1607_v52 = vrot.slane %v1593_v35, %v4285_v25 }
 0x238   : > { %v1608_v56 = vcombine.high %v1600_v53, %v1600_v53  ;;  %v1358_v63 = vsel %vm1346_vm9, %v1325_v60, %v1042_v51  ;;  %v2157_v35 = vrot.slane %v2143_v58, %v4285_v25 }
 0x239   : > { %v2313_v13 = vcombine.low %v1839_v40, %v1838_v36  ;;  %v2109_v2 = vcombine.low %v1607_v52, %v4834_v27  ;;  %v1391_v18 = vsel %vm1379_vm10, %v1358_v63, 0.0  ;;  %v2320_v17 = vrot.slane %v2312_v55, %v4285_v25  ;;  %v5467_v40 = vld [vmem:[#allocation67_spill] sm:$0xff] }
 0x23a   : > { %v2108_v50 = vcombine.low %v1600_v53, %v1608_v56  ;;  %v1626_v26 = vcombine.high %v1391_v18, %v1391_v18  ;;  %v1633_v6 = vrot.slane %v1391_v18, %v4285_v25  ;;  %v1070_v42 = vpop.permute.xlu1 %1069  ;;  %v1046_v48 = vpop.permute.xlu0 %1045  ;;  %v2167_v56 = vrot.slane %v2159_v21, %v4285_v25 }
 0x23b   : > { %v1372_v37 = vsel %vm1346_vm9, %v1339_v0, %v1070_v42  ;;  %v1360_v62 = vsel %vm1346_vm9, %v1327_v34, %v1046_v48  ;;  %v2327_v31 = vrot.slane %v2313_v13, %v4285_v25  ;;  %v2123_v24 = vrot.slane %v2109_v2, %v4285_v25  ;;  %v5468_v2 = vld [vmem:[#allocation34_spill] sm:$0xff] }
 0x23c   : > { %v2116_v27 = vrot.slane %v2108_v50, %v4285_v25  ;;  %v1640_v46 = vrot.slane %v1626_v26, %v4285_v25  ;;  %v1641_v11 = vcombine.high %v1633_v6, %v1633_v6  ;;  %v2126_v28 = vcombine.low %v1625_v39, %v1633_v6  ;;  %v5469_v50 = vld [vmem:[#allocation30_spill] sm:$0xff] }
 0x23d   : > { %v1405_v1 = vsel %vm1379_vm10, %v1372_v37, 0.0  ;;  %v4913_v19 = vsel %vm1379_vm10, %v1360_v62, 0.0  ;;  %v2328_v4 = vcombine.low %v2320_v17, %v2327_v31  ;;  %v1242_v18 = vsel %vm1214_vm5, %v5468_v2, %v4815_v45 }
 0x23e   : > { %v2140_v59 = vrot.slane %v2126_v28, %v4285_v25  ;;  %v2142_v43 = vcombine.low %v1641_v11, %v1640_v46  ;;  %v1857_v20 = vcombine.high %v1405_v1, %v1405_v1  ;;  %v1864_v10 = vrot.slane %v1405_v1, %v4285_v25  ;;  %v681_v16 = vpop.permute.xlu1 %680  ;;  %v653_v29 = vpop.permute.xlu0 %652 }
 0x23f   : > { %v1666_v39 = vrot.slane %v4913_v19, %v4285_v25  ;;  %v4923_v12 = vsel %vm1214_vm5, %v5465_v7, %v681_v16  ;;  %v1229_v54 = vsel %vm1214_vm5, %v5466_v47, %v653_v29  ;;  %v2486_v9 = vpack.c.bf16 %v2345_v49, %v2328_v4 }
 0x240   : > { %v1871_v32 = vrot.slane %v1857_v20, %v4285_v25  ;;  %v1872_v41 = vcombine.high %v1864_v10, %v1864_v10  ;;  %v2124_v23 = vcombine.low %v2116_v27, %v2123_v24  ;;  %v2141_v38 = vcombine.low %v2133_v61, %v2140_v59 }
 0x241   : > { %v1674_v57 = vcombine.high %v1666_v39, %v1666_v39  ;;  %v2150_v22 = vrot.slane %v2142_v43, %v4285_v25  ;;  %2891 = vmatprep.mubr.bf16.mxu1 %v2486_v9  ;;  %v1275_v5 = vsel %vm1247_vm6, %v1242_v18, %v4838_v3  ;;  %v1887_v42 = vrot.slane %v1873_v8, %v4285_v25 }
 0x242   : > { %v2346_v53 = vcombine.low %v1864_v10, %v1872_v41  ;;  %v2347_v44 = vcombine.low %v1871_v32, %v1880_v14  ;;  %v657_v60 = vpop.permute.xlu1 %656  ;;  %v975_v51 = vpop.permute.xlu0 %974  ;;  %v2480_v52 = vpack.c.bf16 %v2141_v38, %v2124_v23  ;;  %v1888_v48 = vcombine.high %v1880_v14, %v1880_v14 }
 0x243   : > { %v2160_v36 = vcombine.low %v1666_v39, %v1674_v57  ;;  %v4932_v55 = vsel %vm1214_vm5, %v5467_v40, %v657_v60  ;;  %v2158_v15 = vcombine.low %v2150_v22, %v2157_v35  ;;  %v1308_v37 = vsel %vm1280_vm7, %v1275_v5, %v4894_v30 }
 0x244   : > { %v2354_v49 = vrot.slane %v2346_v53, %v4285_v25  ;;  %v2361_v61 = vrot.slane %v2347_v44, %v4285_v25  ;;  %2879 = vmatprep.mubr.bf16.mxu0 %v2480_v52  ;;  %v1341_v31 = vsel %vm1313_vm8, %v1308_v37, %v975_v51  ;;  %v2363_v11 = vcombine.low %v1888_v48, %v1887_v42 }
 0x245   : > { %v2174_v0 = vrot.slane %v2160_v36, %v4285_v25  ;;  %v1889_v28 = vcombine.high %v1887_v42, %v1887_v42 }
 0x246   : > { %v752_v63 = vpop.permute.xlu1 %751  ;;  %v685_v34 = vpop.permute.xlu0 %684  ;;  %v2362_v13 = vcombine.low %v2354_v49, %v2361_v61  ;;  %v2371_v16 = vrot.slane %v2363_v11, %v4285_v25 }
 0x247   : > { %v1262_v17 = vsel %vm1247_vm6, %v1229_v54, %v752_v63  ;;  %v4946_v26 = vsel %vm1214_vm5, %v5469_v50, %v685_v34  ;;  %v2175_v6 = vcombine.low %v2167_v56, %v2174_v0  ;;  %v1659_v0 = vcombine.high %v4913_v19, %v4913_v19 }
 0x249   : > { %v2481_v62 = vpack.c.bf16 %v2175_v6, %v2158_v15  ;;  %v1673_v19 = vrot.slane %v1659_v0, %v4285_v25  ;;  %v5472_v0 = vld [vmem:[#allocation69_spill] sm:$0xff] }
 0x24a   : > { %v1074_v45 = vpop.permute.xlu1 %1073  ;;  %v780_v24 = vpop.permute.xlu0 %779 }
 0x24b   : > { %2880 = vmatmul.mubr.bf16.gmra.mrb[8].mxu0 %v2481_v62  ;;  %v1374_v27 = vsel %vm1346_vm9, %v1341_v31, %v1074_v45  ;;  %v1276_v61 = vsel %vm1247_vm6, %v4923_v12, %v780_v24 }
 0x24c   : > { %v1407_v46 = vsel %vm1379_vm10, %v1374_v27, 0.0 }
 0x24d   : > { %v1890_v58 = vcombine.high %v1407_v46, %v1407_v46  ;;  %v1897_v3 = vrot.slane %v1407_v46, %v4285_v25 }
 0x24e   : > { %v4957_v1 = vpop.permute.xlu1 %682 }
 0x24f   : > { %v1904_v4 = vrot.slane %v1890_v58, %v4285_v25  ;;  %v1905_v30 = vcombine.high %v1897_v3, %v1897_v3  ;;  %v2364_v59 = vcombine.low %v1889_v28, %v1897_v3  ;;  %v4960_v43 = vpop.permute.xlu0 %654 }
 0x251   : > { %v2378_v20 = vrot.slane %v2364_v59, %v4285_v25  ;;  %v4963_v10 = vcombine.low %v1905_v30, %v1904_v4 }
 0x252   : > { %v4966_v29 = vpop.permute.xlu1 %783 }
 0x253   : > { %v4968_v14 = vpop.permute.xlu0 %755  ;;  %v2379_v39 = vcombine.low %v2371_v16, %v2378_v20  ;;  %v2388_v30 = vrot.slane %v4963_v10, %v4285_v25  ;;  %v1278_v59 = vsel %vm1247_vm6, %v4946_v26, %v4966_v29 }
 0x255   : > { %v2487_v7 = vpack.c.bf16 %v2379_v39, %v2362_v13  ;;  %v1264_v39 = vsel %vm1247_vm6, %v4932_v55, %v4968_v14 }
 0x256   : > { %v878_v47 = vpop.permute.xlu1 %877 }
 0x257   : > { %v850_v54 = vpop.permute.xlu0 %849  ;;  %2892 = vmatmul.mubr.bf16.gmra.mrb[4].mxu1 %v2487_v7  ;;  %v1309_v8 = vsel %vm1280_vm7, %v1276_v61, %v878_v47 }
 0x258   : > { %v1295_v56 = vsel %vm1280_vm7, %v1262_v17, %v850_v54 }
 0x25a   : > { %v4970_v32 = vpop.permute.xlu1 %686 }
 0x25b   : > { %v4972_v41 = vpop.permute.xlu0 %658 }
 0x25e   : > { %v4975_v9 = vpop.permute.xlu1 %781 }
 0x25f   : > { %v4977_v23 = vpop.permute.xlu0 %753 }
 0x262   : > { %v882_v21 = vpop.permute.xlu1 %881 }
 0x263   : > { %v854_v57 = vpop.permute.xlu0 %853  ;;  %v1311_v7 = vsel %vm1280_vm7, %v1278_v59, %v882_v21  ;;  %v5470_v21 = vld [vmem:[#allocation68_spill] sm:$0xff] }
 0x264   : > { %v1297_v54 = vsel %vm1280_vm7, %v1264_v39, %v854_v57  ;;  %v1244_v57 = vsel %vm1214_vm5, %v5470_v21, %v4957_v1 }
 0x265   : > { %v2873_v38 = vpop.f32.mrb[0].mxu0 }
 0x266   : > { %2701 = vst [vmem:[%s4981_s4 + $0x10] sm:$0xff] %v2873_v38  ;;  %v2588_v22 = vpop.f32.mrb[1].mxu0  ;;  %v977_v35 = vpop.permute.xlu1 %976 }
 0x267   : > { %2699 = vst [vmem:[%s4981_s4] sm:$0xff] %v2588_v22  ;;  %v2874_v53 = vpop.f32.mrb[2].mxu0  ;;  %v949_v44 = vpop.permute.xlu0 %948  ;;  %v1342_v63 = vsel %vm1313_vm8, %v1309_v8, %v977_v35 }
 0x268   : > { %2702 = vst [vmem:[%s4981_s4 + $0x18] sm:$0xff] %v2874_v53  ;;  %v2591_v60 = vpop.f32.mrb[3].mxu0  ;;  %v1328_v13 = vsel %vm1313_vm8, %v1295_v56, %v949_v44  ;;  %v1246_v56 = vsel %vm1214_vm5, %v5472_v0, %v4970_v32 }
 0x269   : > { %2700 = vst [vmem:[%s4981_s4 + $0x8] sm:$0xff] %v2591_v60  ;;  %v5471_v60 = vld [vmem:[#allocation5_spill] sm:$0xff] }
 0x26a   : > { %v4987_v51 = vpop.permute.xlu1 %785 }
 0x26b   : > { %v4989_v36 = vpop.permute.xlu0 %757 }
 0x26e   : > { %v4991_v40 = vpop.permute.xlu1 %879 }
 0x26f   : > { %v4993_v52 = vpop.permute.xlu0 %851 }
 0x272   : > { %v981_v49 = vpop.permute.xlu1 %980 }
 0x273   : > { %v953_v15 = vpop.permute.xlu0 %952  ;;  %v1344_v10 = vsel %vm1313_vm8, %v1311_v7, %v981_v49  ;;  %v1230_v49 = vsel %vm1214_vm5, %v5471_v60, %v4960_v43  ;;  %v1277_v43 = vsel %vm1247_vm6, %v1244_v57, %v4975_v9 }
 0x274   : > { %v1330_v26 = vsel %vm1313_vm8, %v1297_v54, %v953_v15 }
 0x276   : > { %v1076_v34 = vpop.permute.xlu1 %1075 }
 0x277   : > { %v1375_v2 = vsel %vm1346_vm9, %v1342_v63, %v1076_v34  ;;  %v1048_v18 = vpop.permute.xlu0 %1047  ;;  %v5473_v63 = vld [vmem:[#allocation25_spill] sm:$0xff] }
 0x278   : > { %v1408_v50 = vsel %vm1379_vm10, %v1375_v2, 0.0  ;;  %v1361_v6 = vsel %vm1346_vm9, %v1328_v13, %v1048_v18  ;;  %v1232_v34 = vsel %vm1214_vm5, %v5473_v63, %v4972_v41  ;;  %v1263_v18 = vsel %vm1247_vm6, %v1230_v49, %v4977_v23 }
 0x279   : > { %v1913_v12 = vrot.slane %v1408_v50, %v4285_v25  ;;  %v1394_v5 = vsel %vm1379_vm10, %v1361_v6, 0.0  ;;  %v1906_v37 = vcombine.high %v1408_v50, %v1408_v50  ;;  %v1279_v50 = vsel %vm1247_vm6, %v1246_v56, %v4987_v51 }
 0x27a   : > { %v1675_v42 = vcombine.high %v1394_v5, %v1394_v5  ;;  %v1682_v17 = vrot.slane %v1394_v5, %v4285_v25  ;;  %v884_v48 = vpop.permute.xlu1 %883  ;;  %v1265_v32 = vsel %vm1247_vm6, %v1232_v34, %v4989_v36  ;;  %v1310_v6 = vsel %vm1280_vm7, %v1277_v43, %v4991_v40 }
 0x27b   : > { %v1921_v62 = vcombine.high %v1913_v12, %v1913_v12  ;;  %v856_v31 = vpop.permute.xlu0 %855  ;;  %v1920_v58 = vrot.slane %v1906_v37, %v4285_v25  ;;  %v1296_v41 = vsel %vm1280_vm7, %v1263_v18, %v4993_v52 }
 0x27c   : > { %v5011_v45 = vrot.slane %v1675_v42, %v4285_v25  ;;  %v1690_v24 = vcombine.high %v1682_v17, %v1682_v17  ;;  %v2176_v27 = vcombine.low %v1673_v19, %v1682_v17  ;;  %v1298_v5 = vsel %vm1280_vm7, %v1265_v32, %v856_v31 }
 0x27d   : > { %v2381_v46 = vcombine.low %v1913_v12, %v1921_v62  ;;  %v1922_v29 = vcombine.high %v1920_v58, %v1920_v58  ;;  %v1312_v12 = vsel %vm1280_vm7, %v1279_v50, %v884_v48 }
 0x27e   : > { %v2177_v11 = vcombine.low %v1690_v24, %v5011_v45  ;;  %v979_v28 = vpop.permute.xlu1 %978  ;;  %v2184_v20 = vrot.slane %v2176_v27, %v4285_v25  ;;  %v1691_v36 = vcombine.high %v5011_v45, %v5011_v45 }
 0x27f   : > { %v2395_v3 = vrot.slane %v2381_v46, %v4285_v25  ;;  %v951_v4 = vpop.permute.xlu0 %950  ;;  %v5053_v13 = vcombine.low %v1920_v58, %v1922_v29  ;;  %v1343_v9 = vsel %vm1313_vm8, %v1310_v6, %v979_v28 }
 0x280   : > { %v2191_v16 = vrot.slane %v2177_v11, %v4285_v25  ;;  %v1329_v40 = vsel %vm1313_vm8, %v1296_v41, %v951_v4 }
 0x281   : > { %v5027_v47 = vcombine.low %v2388_v30, %v2395_v3  ;;  %v2405_v48 = vrot.slane %v5053_v13, %v4285_v25 }
 0x282   : > { %v1080_v38 = vpop.permute.xlu1 %1079  ;;  %v5031_v22 = vcombine.low %v2184_v20, %v2191_v16 }
 0x283   : > { %v1377_v35 = vsel %vm1346_vm9, %v1344_v10, %v1080_v38  ;;  %v1052_v53 = vpop.permute.xlu0 %1051 }
 0x284   : > { %v1410_v44 = vsel %vm1379_vm10, %v1377_v35, 0.0  ;;  %v1363_v55 = vsel %vm1346_vm9, %v1330_v26, %v1052_v53 }
 0x285   : > { %v1396_v14 = vsel %vm1379_vm10, %v1363_v55, 0.0  ;;  %v1939_v61 = vcombine.high %v1410_v44, %v1410_v44  ;;  %v5045_v15 = vrot.slane %v1410_v44, %v4285_v25 }
 0x286   : > { %v983_v8 = vpop.permute.xlu1 %982  ;;  %v1708_v1 = vcombine.high %v1396_v14, %v1396_v14  ;;  %v1715_v37 = vrot.slane %v1396_v14, %v4285_v25 }
 0x287   : > { %v955_v2 = vpop.permute.xlu0 %954  ;;  %v1953_v23 = vrot.slane %v1939_v61, %v4285_v25  ;;  %v1954_v51 = vcombine.high %v5045_v15, %v5045_v15  ;;  %v1345_v62 = vsel %vm1313_vm8, %v1312_v12, %v983_v8 }
 0x288   : > { %v1722_v42 = vrot.slane %v1708_v1, %v4285_v25  ;;  %v1331_v45 = vsel %vm1313_vm8, %v1298_v5, %v955_v2  ;;  %v1723_v55 = vcombine.high %v1715_v37, %v1715_v37 }
 0x289   : > { %v2415_v28 = vcombine.low %v1954_v51, %v1953_v23  ;;  %v1955_v30 = vcombine.high %v1953_v23, %v1953_v23 }
 0x28a   : > { %v1078_v19 = vpop.permute.xlu1 %1077  ;;  %v1724_v59 = vcombine.high %v1722_v42, %v1722_v42  ;;  %v2210_v43 = vcombine.low %v1715_v37, %v1723_v55 }
 0x28b   : > { %v1376_v52 = vsel %vm1346_vm9, %v1343_v9, %v1078_v19  ;;  %v1050_v17 = vpop.permute.xlu0 %1049  ;;  %v2429_v57 = vrot.slane %v2415_v28, %v4285_v25 }
 0x28c   : > { %v1409_v31 = vsel %vm1379_vm10, %v1376_v52, 0.0  ;;  %v1362_v24 = vsel %vm1346_vm9, %v1329_v40, %v1050_v17  ;;  %v2211_v34 = vcombine.low %v1722_v42, %v1724_v59  ;;  %v2218_v42 = vrot.slane %v2210_v43, %v4285_v25 }
 0x28d   : > { %v1923_v27 = vcombine.high %v1409_v31, %v1409_v31  ;;  %v1930_v46 = vrot.slane %v1409_v31, %v4285_v25  ;;  %v1395_v11 = vsel %vm1379_vm10, %v1362_v24, 0.0 }
 0x28e   : > { %v1692_v58 = vcombine.high %v1395_v11, %v1395_v11  ;;  %v1699_v3 = vrot.slane %v1395_v11, %v4285_v25  ;;  %v1082_v4 = vpop.permute.xlu1 %1081 }
 0x28f   : > { %v1937_v20 = vrot.slane %v1923_v27, %v4285_v25  ;;  %v1938_v16 = vcombine.high %v1930_v46, %v1930_v46  ;;  %v1378_v39 = vsel %vm1346_vm9, %v1345_v62, %v1082_v4  ;;  %v1054_v7 = vpop.permute.xlu0 %1053 }
 0x290   : > { %v1706_v54 = vrot.slane %v1692_v58, %v4285_v25  ;;  %v1707_v10 = vcombine.high %v1699_v3, %v1699_v3  ;;  %v2193_v38 = vcombine.low %v1691_v36, %v1699_v3  ;;  %v1411_v26 = vsel %vm1379_vm10, %v1378_v39, 0.0 }
 0x291   : > { %v2398_v29 = vcombine.low %v1930_v46, %v1938_v16  ;;  %v2414_v35 = vcombine.low %v1937_v20, %v5045_v15  ;;  %v1956_v53 = vcombine.high %v1411_v26, %v1411_v26  ;;  %v1963_v44 = vrot.slane %v1411_v26, %v4285_v25 }
 0x292   : > { %v2194_v14 = vcombine.low %v1707_v10, %v1706_v54  ;;  %v1364_v21 = vsel %vm1346_vm9, %v1331_v45, %v1054_v7  ;;  %v2201_v0 = vrot.slane %v2193_v38, %v4285_v25  ;;  %v2225_v36 = vrot.slane %v2211_v34, %v4285_v25 }
 0x293   : > { %v2412_v60 = vrot.slane %v2398_v29, %v4285_v25  ;;  %v1970_v49 = vrot.slane %v1956_v53, %v4285_v25  ;;  %v1971_v61 = vcombine.high %v1963_v44, %v1963_v44  ;;  %v2431_v8 = vcombine.low %v1955_v30, %v1963_v44 }
 0x294   : > { %v1397_v56 = vsel %vm1379_vm10, %v1364_v21, 0.0  ;;  %v2208_v15 = vrot.slane %v2194_v14, %v4285_v25  ;;  %v2422_v63 = vrot.slane %v2414_v35, %v4285_v25  ;;  %v2226_v17 = vcombine.low %v2218_v42, %v2225_v36 }
 0x295   : > { %v2432_v13 = vcombine.low %v1971_v61, %v1970_v49  ;;  %v1725_v1 = vcombine.high %v1397_v56, %v1397_v56  ;;  %v1732_v2 = vrot.slane %v1397_v56, %v4285_v25  ;;  %v2413_v50 = vcombine.low %v2405_v48, %v2412_v60 }
 0x296   : > { %v2209_v18 = vcombine.low %v2201_v0, %v2208_v15  ;;  %v2430_v32 = vcombine.low %v2422_v63, %v2429_v57  ;;  %v2439_v6 = vrot.slane %v2431_v8, %v4285_v25 }
 0x297   : > { %v1739_v41 = vrot.slane %v1725_v1, %v4285_v25  ;;  %v1740_v12 = vcombine.high %v1732_v2, %v1732_v2  ;;  %v2446_v5 = vrot.slane %v2432_v13, %v4285_v25  ;;  %v2488_v23 = vpack.c.bf16 %v2413_v50, %v5027_v47 }
 0x298   : > { %v2482_v9 = vpack.c.bf16 %v2209_v18, %v5031_v22 }
 0x299   : > { %v2227_v51 = vcombine.low %v1732_v2, %v1740_v12  ;;  %v2228_v19 = vcombine.low %v1739_v41, %v4540_v33  ;;  %v2447_v40 = vcombine.low %v2439_v6, %v2446_v5  ;;  %2895 = vmatprep.mubr.bf16.mxu1 %v2488_v23 }
 0x29a   : > { %2883 = vmatprep.mubr.bf16.mxu0 %v2482_v9 }
 0x29b   : > { %v2235_v52 = vrot.slane %v2227_v51, %v4285_v25  ;;  %v2242_v22 = vrot.slane %v2228_v19, %v4285_v25  ;;  %v2489_v47 = vpack.c.bf16 %v2447_v40, %v2430_v32 }
 0x29d   : > { %v2243_v48 = vcombine.low %v2235_v52, %v2242_v22  ;;  %2896 = vmatmul.mubr.bf16.gmra.mrb[8].mxu1 %v2489_v47 }
 0x29f   : > { %v2483_v33 = vpack.c.bf16 %v2243_v48, %v2226_v17 }
 0x2a1   : > { %2884 = vmatmul.mubr.bf16.gmra.mrb[12].mxu0 %v2483_v33 }
 0x2ba   : > { %v2877_v37 = vpop.f32.mrb[4].mxu0 }
 0x2bb   : > { %2705 = vst [vmem:[%s4981_s4 + $0x30] sm:$0xff] %v2877_v37  ;;  %v2604_v62 = vpop.f32.mrb[5].mxu0 }
 0x2bc   : > { %2703 = vst [vmem:[%s4981_s4 + $0x20] sm:$0xff] %v2604_v62  ;;  %v2878_v31 = vpop.f32.mrb[6].mxu0 }
 0x2bd   : > { %2706 = vst [vmem:[%s4981_s4 + $0x38] sm:$0xff] %v2878_v31  ;;  %v2607_v25 = vpop.f32.mrb[7].mxu0 }
 0x2be   : > { %2704 = vst [vmem:[%s4981_s4 + $0x28] sm:$0xff] %v2607_v25  ;;  %v2889_v24 = vpop.f32.mrb[0].mxu1 }
 0x2bf   : > { %2717 = vst [vmem:[%s4981_s4 + $0x90] sm:$0xff] %v2889_v24  ;;  %v2652_v45 = vpop.f32.mrb[1].mxu1 }
 0x2c0   : > { %2715 = vst [vmem:[%s4981_s4 + $0x80] sm:$0xff] %v2652_v45  ;;  %v2890_v27 = vpop.f32.mrb[2].mxu1 }
 0x2c1   : > { %2718 = vst [vmem:[%s4981_s4 + $0x98] sm:$0xff] %v2890_v27  ;;  %v2655_v46 = vpop.f32.mrb[3].mxu1 }
 0x2c2   : > { %2716 = vst [vmem:[%s4981_s4 + $0x88] sm:$0xff] %v2655_v46 }
 0x31e   : > { %v2881_v11 = vpop.f32.mrb[8].mxu0 }
 0x31f   : > { %2709 = vst [vmem:[%s4981_s4 + $0x50] sm:$0xff] %v2881_v11  ;;  %v2620_v28 = vpop.f32.mrb[9].mxu0 }
 0x320   : > { %2707 = vst [vmem:[%s4981_s4 + $0x40] sm:$0xff] %v2620_v28  ;;  %v2882_v58 = vpop.f32.mrb[10].mxu0 }
 0x321   : > { %2710 = vst [vmem:[%s4981_s4 + $0x58] sm:$0xff] %v2882_v58  ;;  %v2623_v3 = vpop.f32.mrb[11].mxu0 }
 0x322   : > { %2708 = vst [vmem:[%s4981_s4 + $0x48] sm:$0xff] %v2623_v3 }
 0x32a   : > { %v2893_v4 = vpop.f32.mrb[4].mxu1 }
 0x32b   : > { %2721 = vst [vmem:[%s4981_s4 + $0xb0] sm:$0xff] %v2893_v4  ;;  %v2668_v30 = vpop.f32.mrb[5].mxu1 }
 0x32c   : > { %2719 = vst [vmem:[%s4981_s4 + $0xa0] sm:$0xff] %v2668_v30  ;;  %v2894_v59 = vpop.f32.mrb[6].mxu1 }
 0x32d   : > { %2722 = vst [vmem:[%s4981_s4 + $0xb8] sm:$0xff] %v2894_v59  ;;  %v2671_v20 = vpop.f32.mrb[7].mxu1 }
 0x32e   : > { %2720 = vst [vmem:[%s4981_s4 + $0xa8] sm:$0xff] %v2671_v20 }
 0x370   : > { %v2897_v16 = vpop.f32.mrb[8].mxu1 }
 0x371   : > { %2725 = vst [vmem:[%s4981_s4 + $0xd0] sm:$0xff] %v2897_v16  ;;  %v2684_v39 = vpop.f32.mrb[9].mxu1 }
 0x372   : > { %2723 = vst [vmem:[%s4981_s4 + $0xc0] sm:$0xff] %v2684_v39  ;;  %v2898_v7 = vpop.f32.mrb[10].mxu1 }
 0x373   : > { %2726 = vst [vmem:[%s4981_s4 + $0xd8] sm:$0xff] %v2898_v7  ;;  %v2687_v54 = vpop.f32.mrb[11].mxu1 }
 0x374   : > { %v2885_v10 = vpop.f32.mrb[12].mxu0  ;;  %2724 = vst [vmem:[%s4981_s4 + $0xc8] sm:$0xff] %v2687_v54 }
 0x375   : > { %2713 = vst [vmem:[%s4981_s4 + $0x70] sm:$0xff] %v2885_v10  ;;  %v2636_v38 = vpop.f32.mrb[13].mxu0 }
 0x376   : > { %2711 = vst [vmem:[%s4981_s4 + $0x60] sm:$0xff] %v2636_v38  ;;  %v2886_v26 = vpop.f32.mrb[14].mxu0 }
 0x377   : > { %2714 = vst [vmem:[%s4981_s4 + $0x78] sm:$0xff] %v2886_v26  ;;  %v2639_v29 = vpop.f32.mrb[15].mxu0 }
 0x378   : > { %2712 = vst [vmem:[%s4981_s4 + $0x68] sm:$0xff] %v2639_v29 }
 0x379   : > { %3025 = shalt.err (!%p3022_p5)
}
 0x37a   : > { %s3026_s6 = scalar_lea.hbm %s5140_s24, 3584  ;;  %s3030_s15 = scalar_lea.hbm %s5197_s2, 7168 }
 0x37b   : > { %p3027_p6 = scmp.ne.s32.totalorder %s5140_s24, %s3026_s6  ;;  %p3031_p10 = scmp.lt.u32.totalorder %s5140_s24, %s5197_s2 }
 0x37c   : > { %p3032_p11 = scmp.lt.u32.totalorder %s3030_s15, %s3026_s6  ;;  %p3034_p13 = scmp.lt.u32.totalorder %s3026_s6, %s5140_s24 }
 0x37d   : > { %p3028_p7 = pnand %p3027_p6, %p3158_p4 }
 0x37e   : > { %p3033_p12 = por %p3032_p11, %p3031_p10 }
 0x37f   : > { %p3029_p9 = pneg %p3028_p7 }
 0x380   : > { %p3035_p0 = por %p3034_p13, %p3033_p12 }
 0x382   : > { %p3036_p1 = pnand %p3035_p0, %p3029_p9 }
 0x384   : > { %3039 = shalt.err (!%p3036_p1)
}
 0x385   : > { %s3102_s3 = smov 128  }
 0x386   : > { %2918 = dma.vmem_to_hbm [thread:$0]  (%p3158_p4), %s5142_s16, 3584, %s5140_s24, %s5148_s12, %s3102_s3, %s3102_s3, %s3093_s29  }
 0x387 PF: > { %p2924_p2 = scmp.ge.s32.totalorder %s3090_s14, 2  ;;  %s2758_s4 = sand.u32 1, %s3070_s9  }
 0x388   : > { %s2759_s5 = scalar_lea.sflag [#allocation3], %s2758_s4 }
 0x389   : > { %p2921_p3 = pnand %p2924_p2, %p3165_p8 }
 0x38b   : > { %3065 = dma.done.wait (!%p2921_p3), %s2759_s5, 3584  }
 0x38c   : > { %3067 = vsyncadd (!%p2921_p3), %s2759_s5, 4294963712  ;;  %s15_s14 = sadd.s32 1, %s3090_s14   ;;  %s5474_s9 = smov %s3074_s10 }
 0x38d   : > { %p12_p5 = scmp.ge.s32.totalorder %s15_s14, 4   ;;  %s5475_s10 = smov %s3078_s11 }
 0x38e   : > { %s5476_s11 = smov %s3171_s22  ;;  %s5477_s12 = smov %s3086_s13 }
 0x38f   : > { %s5478_s13 = smov %s5480_s17  ;;  %14 = sbr.rel (!%p12_p5) target bundleno = 4 (0x4), region = 63 }
 0x396   :  { %2764 = vsyncpa [#allocation3], 1 }
 0x397   :  { %2766 = vsyncpa [#allocation3 + $0x1], 1 }

</bundles_post_ra>
